<compile_context>
chip_gen: v5e
topology: v5e:2x2
jax: 0.10.0
libtpu: 0.0.40
codegen_flags: <defaults>
</compile_context>

<pallas_src>
import math
import functools

import jax
import jax.numpy as jnp
from jax import lax
from jax.experimental import pallas as pl
from jax.experimental.pallas import tpu as pltpu


def _layer_norm(x, gamma, beta, eps=1e-5):
    # PyTorch nn.LayerNorm: biased variance, eps inside sqrt.  All f32.
    mean = jnp.mean(x, axis=-1, keepdims=True)
    var = jnp.mean(jnp.square(x - mean), axis=-1, keepdims=True)
    return (x - mean) * lax.rsqrt(var + eps) * gamma + beta


def block_kernel(x_ref, ln1g_ref, ln1b_ref, wq_ref, wk_ref, wv_ref, wproj_ref,
                 ln2g_ref, ln2b_ref, w1_ref, b1_ref, w2_ref, b2_ref,
                 y_ref, k_scr, v_scr, q_scr, *, n_head, q_tile, compute_dtype):
    f32 = jnp.float32
    _, T, C = x_ref.shape
    H = n_head
    hd = C // H
    tq = q_tile
    scale = 1.0 / math.sqrt(hd)
    MASK = f32(-1e30)          # finite mask value (robust, identical to -inf here)

    qt = pl.program_id(1)

    # ---- hoisted parameter loads (once per kernel invocation) ----
    g1 = ln1g_ref[...].astype(f32)
    be1 = ln1b_ref[...].astype(f32)
    g2 = ln2g_ref[...].astype(f32)
    be2 = ln2b_ref[...].astype(f32)
    b1v = b1_ref[...].astype(f32)
    b2v = b2_ref[...].astype(f32)

    # ---- K / V for the whole sequence: computed once per batch element ----
    @pl.when(qt == 0)
    def _compute_kv():
        x_full = x_ref[0].astype(f32)                       # (T, C)
        xn = _layer_norm(x_full, g1, be1)
        xn_c = xn.astype(compute_dtype)
        k_full = jnp.dot(xn_c, wk_ref[...], preferred_element_type=f32)   # (T, C)
        v_full = jnp.dot(xn_c, wv_ref[...], preferred_element_type=f32)   # (T, C)
        for h in range(H):                                  # one-time head split
            k_scr[h] = k_full[:, h * hd:(h + 1) * hd].astype(compute_dtype)
            v_scr[h] = v_full[:, h * hd:(h + 1) * hd].astype(compute_dtype)

    # ---- current query tile: LN1 + Q projection ----
    q_start = pl.multiple_of(qt * tq, tq)
    x_q = x_ref[0, pl.ds(q_start, tq), :].astype(f32)       # (tq, C)
    xn_q = _layer_norm(x_q, g1, be1)
    q2 = jnp.dot(xn_q.astype(compute_dtype), wq_ref[...],
                 preferred_element_type=f32) * scale        # (tq, C) f32
    for h in range(H):
        q_scr[h] = q2[:, h * hd:(h + 1) * hd].astype(compute_dtype)
    q_h = q_scr[...]                                        # (H, tq, hd)

    # ---- flash-style online softmax over causal KV tiles ----
    row_ids = q_start + lax.broadcasted_iota(jnp.int32, (tq, tq), 0)   # hoisted
    col_base = lax.broadcasted_iota(jnp.int32, (tq, tq), 1)

    def kv_step(j, carry):
        m, l, acc = carry
        kv_start = pl.multiple_of(j * tq, tq)
        k_t = k_scr[:, pl.ds(kv_start, tq), :]              # (H, tq, hd)
        v_t = v_scr[:, pl.ds(kv_start, tq), :]
        # batched QK^T over heads; contraction on trailing dims (no explicit .T)
        s = lax.dot_general(q_h, k_t, (((2,), (2,)), ((0,), (0,))),
                            preferred_element_type=f32)     # (H, tq, tq) f32
        mask = (kv_start + col_base) <= row_ids             # causal
        s = jnp.where(mask[None, :, :], s, MASK)
        m_new = jnp.maximum(m, jnp.max(s, axis=-1, keepdims=True))
        alpha = jnp.exp(m - m_new)
        p = jnp.exp(s - m_new)
        l_new = alpha * l + jnp.sum(p, axis=-1, keepdims=True)
        pv = lax.dot_general(p.astype(compute_dtype), v_t,
                             (((2,), (1,)), ((0,), (0,))),
                             preferred_element_type=f32)    # (H, tq, hd)
        acc_new = alpha * acc + pv
        return m_new, l_new, acc_new

    m0 = jnp.full((H, tq, 1), MASK, f32)
    l0 = jnp.zeros((H, tq, 1), f32)
    acc0 = jnp.zeros((H, tq, hd), f32)
    # causal: only tiles j = 0 .. qt contribute
    m, l, acc = lax.fori_loop(0, qt + 1, kv_step, (m0, l0, acc0))

    attn = acc * pl.reciprocal(l, approx=True)              # (H, tq, hd) f32
    attn2d = jnp.concatenate([attn[h] for h in range(H)], axis=-1)     # (tq, C)
    proj = jnp.dot(attn2d.astype(compute_dtype), wproj_ref[...],
                   preferred_element_type=f32)
    x1 = x_q + proj                                         # residual 1 (f32)

    # ---- LN2 + MLP ----
    xn2 = _layer_norm(x1, g2, be2)
    h1 = jnp.dot(xn2.astype(compute_dtype), w1_ref[...],
                 preferred_element_type=f32) + b1v
    h1 = jnp.maximum(h1, 0.0)                               # ReLU (f32)
    h2 = jnp.dot(h1.astype(compute_dtype), w2_ref[...],
                 preferred_element_type=f32) + b2v
    y_ref[0] = (x1 + h2).astype(y_ref.dtype)                # residual 2


def transformer_block(x, params, n_head, *, q_tile=None, compute_dtype=None,
                      single_buffer_weights=False):
    (ln1g, ln1b, wqkv, wproj, ln2g, ln2b, w1, b1, w2, b2) = params
    B, T, C = x.shape
    assert C % n_head == 0
    hd = C // n_head

    if compute_dtype is None:
        compute_dtype = x.dtype
    compute_dtype = jnp.bfloat16 if compute_dtype == jnp.bfloat16 else jnp.float32

    # query tile: largest of these that divides T (sublane-friendly), else full T
    if q_tile is None:
        q_tile = T
        for cand in (512, 256, 128, 64, 32, 16, 8):
            if T % cand == 0:
                q_tile = cand
                break
    assert T % q_tile == 0
    nq = T // q_tile

    f32 = jnp.float32
    wq, wk, wv = (w.astype(compute_dtype) for w in jnp.split(wqkv, 3, axis=1))
    wprojc = wproj.astype(compute_dtype)
    w1c = w1.astype(compute_dtype)
    w2c = w2.astype(compute_dtype)
    ln1g32, ln1b32 = ln1g.astype(f32), ln1b.astype(f32)
    ln2g32, ln2b32 = ln2g.astype(f32), ln2b.astype(f32)
    b1_32, b2_32 = b1.astype(f32), b2.astype(f32)

    def const_spec(arr):
        zeros = (0,) * arr.ndim
        if single_buffer_weights:
            return pl.BlockSpec(arr.shape, lambda b, qt: zeros,
                                pipeline_mode=pl.Buffered(1))
        return pl.BlockSpec(arr.shape, lambda b, qt: zeros)

    # ---- VMEM budget / cost estimate ----
    weights = (wq, wk, wv, wprojc, w1c, w2c,
               ln1g32, ln1b32, ln2g32, ln2b32, b1_32, b2_32)
    weight_bytes = sum(int(a.size) * a.dtype.itemsize for a in weights)
    itemsize_c = wq.dtype.itemsize
    hd_pad = max(hd, 128)                                  # lane padding
    scratch_bytes = (2 * n_head * T + n_head * q_tile) * hd_pad * itemsize_c
    act_bytes = (T * C + 2 * q_tile * C) * x.dtype.itemsize
    live_bytes = q_tile * 8 * C * 4 + n_head * T * hd_pad * 4
    est = 2 * weight_bytes + 2 * act_bytes + scratch_bytes + live_bytes
    vmem_limit = int(min(max(2 * est, 32 * 1024 * 1024), 64 * 1024 * 1024))

    flops = int(2 * B * T * C * (3 * C)        # qkv projection
                + 4 * B * T * T * C            # QK^T + PV
                + 2 * B * T * C * C            # attention output projection
                + 4 * B * T * C * (4 * C))     # MLP fc1 + fc2
    transcendentals = int(B * n_head * T * T + 4 * B * T)
    bytes_accessed = int(2 * B * T * C * x.dtype.itemsize + weight_bytes)

    kernel = functools.partial(block_kernel, n_head=n_head, q_tile=q_tile,
                               compute_dtype=compute_dtype)

    return pl.pallas_call(
        kernel,
        out_shape=jax.ShapeDtypeStruct((B, T, C), x.dtype),
        grid_spec=pltpu.PrefetchScalarGridSpec(
            num_scalar_prefetch=0,
            grid=(B, nq),
            in_specs=[
                pl.BlockSpec((1, T, C), lambda b, qt: (b, 0, 0)),   # x (resident per b)
                const_spec(ln1g32), const_spec(ln1b32),
                const_spec(wq), const_spec(wk), const_spec(wv),
                const_spec(wprojc),
                const_spec(ln2g32), const_spec(ln2b32),
                const_spec(w1c), const_spec(b1_32),
                const_spec(w2c), const_spec(b2_32),
            ],
            out_specs=pl.BlockSpec((1, q_tile, C), lambda b, qt: (b, qt, 0)),
            scratch_shapes=[
                pltpu.VMEM((n_head, T, hd), compute_dtype),        # K (head-major)
                pltpu.VMEM((n_head, T, hd), compute_dtype),        # V (head-major)
                pltpu.VMEM((n_head, q_tile, hd), compute_dtype),   # Q tile (head-major)
            ],
        ),
        compiler_params=pltpu.CompilerParams(
            # q-tile axis must stay sequential ("arbitrary"): K/V scratch is
            # computed at qt==0 and reused across q-tiles of the same batch elem.
            dimension_semantics=("parallel", "arbitrary"),
            vmem_limit_bytes=vmem_limit,
        ),
        cost_estimate=pl.CostEstimate(flops=flops,
                                      transcendentals=transcendentals,
                                      bytes_accessed=bytes_accessed),
    )(x, ln1g32, ln1b32, wq, wk, wv, wprojc, ln2g32, ln2b32, w1c, b1_32, w2c, b2_32)


# ------------------------- pure-JAX reference -------------------------
def block_reference(x, params, n_head):
    (ln1g, ln1b, wqkv, wproj, ln2g, ln2b, w1, b1, w2, b2) = params
    B, T, C = x.shape
    hd = C // n_head

    def ln(z, g, b):
        m = z.mean(-1, keepdims=True)
        v = ((z - m) ** 2).mean(-1, keepdims=True)
        return (z - m) / jnp.sqrt(v + 1e-5) * g + b

    xn = ln(x, ln1g[0], ln1b[0])
    qkv = xn @ wqkv
    q, k, v = jnp.split(qkv, 3, axis=-1)
    q = q.reshape(B, T, n_head, hd).transpose(0, 2, 1, 3)
    k = k.reshape(B, T, n_head, hd).transpose(0, 2, 1, 3)
    v = v.reshape(B, T, n_head, hd).transpose(0, 2, 1, 3)
    att = (q @ jnp.swapaxes(k, -2, -1)) / math.sqrt(hd)
    mask = jnp.tril(jnp.ones((T, T), bool))
    att = jnp.where(mask, att, -jnp.inf)
    att = jax.nn.softmax(att, axis=-1)
    out = (att @ v).transpose(0, 2, 1, 3).reshape(B, T, C)
    x1 = x + out @ wproj

    xn2 = ln(x1, ln2g[0], ln2b[0])
    h = jnp.maximum(xn2 @ w1 + b1[0], 0.0)
    return x1 + h @ w2 + b2[0]


if __name__ == "__main__":
    B, T, C, n_head = 2, 8, 32, 4        # block_size = T = 8

    key = jax.random.PRNGKey(0)
    ks = jax.random.split(key, 11)
    s = 0.1
    params = (
        1.0 + s * jax.random.normal(ks[0], (1, C), jnp.float32),        # ln1 gamma
        s * jax.random.normal(ks[1], (1, C), jnp.float32),              # ln1 beta
        s * jax.random.normal(ks[2], (C, 3 * C), jnp.float32),          # W_qkv^T
        s * jax.random.normal(ks[3], (C, C), jnp.float32),              # W_proj^T
        1.0 + s * jax.random.normal(ks[4], (1, C), jnp.float32),        # ln2 gamma
        s * jax.random.normal(ks[5], (1, C), jnp.float32),              # ln2 beta
        s * jax.random.normal(ks[6], (C, 4 * C), jnp.float32),          # W1^T
        s * jax.random.normal(ks[7], (1, 4 * C), jnp.float32),          # b1
        s * jax.random.normal(ks[8], (4 * C, C), jnp.float32),          # W2^T
        s * jax.random.normal(ks[9], (1, C), jnp.float32),              # b2
    )
    x = jax.random.normal(ks[10], (B, T, C), jnp.float32)

    y_ref = block_reference(x, params, n_head)

    # f32 compute path (tolerance covers the approximate EUP reciprocal).
    y = transformer_block(x, params, n_head)
    jax.block_until_ready(y)
    assert y.shape == (B, T, C)
    assert jnp.allclose(y, y_ref, atol=2e-3, rtol=2e-3), \
        f"f32 max err {jnp.max(jnp.abs(y - y_ref))}"

    # bf16 matmul inputs with f32 accumulation / stats (looser tolerance).
    y_bf16 = transformer_block(x, params, n_head, compute_dtype=jnp.bfloat16)
    jax.block_until_ready(y_bf16)
    assert jnp.allclose(y_bf16, y_ref, atol=6e-2, rtol=6e-2), \
        f"bf16 max err {jnp.max(jnp.abs(y_bf16 - y_ref))}"

    print("KERNEL_OK")
</pallas_src>

<mosaic_0001>
module attributes {stable_mosaic.version = 11 : i64} {
  func.func @block_kernel(%arg0: i32, %arg1: i32, %arg2: memref<1x8x32xf32, #tpu.memory_space<vmem>>, %arg3: memref<1x32xf32, #tpu.memory_space<vmem>>, %arg4: memref<1x32xf32, #tpu.memory_space<vmem>>, %arg5: memref<32x32xf32, #tpu.memory_space<vmem>>, %arg6: memref<32x32xf32, #tpu.memory_space<vmem>>, %arg7: memref<32x32xf32, #tpu.memory_space<vmem>>, %arg8: memref<32x32xf32, #tpu.memory_space<vmem>>, %arg9: memref<1x32xf32, #tpu.memory_space<vmem>>, %arg10: memref<1x32xf32, #tpu.memory_space<vmem>>, %arg11: memref<32x128xf32, #tpu.memory_space<vmem>>, %arg12: memref<1x128xf32, #tpu.memory_space<vmem>>, %arg13: memref<128x32xf32, #tpu.memory_space<vmem>>, %arg14: memref<1x32xf32, #tpu.memory_space<vmem>>, %arg15: memref<1x8x32xf32, #tpu.memory_space<vmem>>, %arg16: memref<4x8x8xf32, #tpu.memory_space<vmem>>, %arg17: memref<4x8x8xf32, #tpu.memory_space<vmem>>, %arg18: memref<4x8x8xf32, #tpu.memory_space<vmem>>) attributes {dimension_semantics = [#tpu.dimension_semantics<parallel>, #tpu.dimension_semantics<arbitrary>], iteration_bounds = array<i64: 2, 1>, scalar_prefetch = 0 : i64, scratch_operands = 3 : i64, tpu.core_type = #tpu.core_type<tc>, window_params = [{transform_indices = @transform_0, window_bounds = array<i64: 1, 8, 32>}, {pipeline_mode = #tpu.pipeline_mode<synchronous>, transform_indices = @transform_1, window_bounds = array<i64: 1, 32>}, {pipeline_mode = #tpu.pipeline_mode<synchronous>, transform_indices = @transform_2, window_bounds = array<i64: 1, 32>}, {pipeline_mode = #tpu.pipeline_mode<synchronous>, transform_indices = @transform_3, window_bounds = array<i64: 32, 32>}, {pipeline_mode = #tpu.pipeline_mode<synchronous>, transform_indices = @transform_4, window_bounds = array<i64: 32, 32>}, {pipeline_mode = #tpu.pipeline_mode<synchronous>, transform_indices = @transform_5, window_bounds = array<i64: 32, 32>}, {pipeline_mode = #tpu.pipeline_mode<synchronous>, transform_indices = @transform_6, window_bounds = array<i64: 32, 32>}, {pipeline_mode = #tpu.pipeline_mode<synchronous>, transform_indices = @transform_7, window_bounds = array<i64: 1, 32>}, {pipeline_mode = #tpu.pipeline_mode<synchronous>, transform_indices = @transform_8, window_bounds = array<i64: 1, 32>}, {pipeline_mode = #tpu.pipeline_mode<synchronous>, transform_indices = @transform_9, window_bounds = array<i64: 32, 128>}, {pipeline_mode = #tpu.pipeline_mode<synchronous>, transform_indices = @transform_10, window_bounds = array<i64: 1, 128>}, {pipeline_mode = #tpu.pipeline_mode<synchronous>, transform_indices = @transform_11, window_bounds = array<i64: 128, 32>}, {pipeline_mode = #tpu.pipeline_mode<synchronous>, transform_indices = @transform_12, window_bounds = array<i64: 1, 32>}, {transform_indices = @transform_13, window_bounds = array<i64: 1, 8, 32>}]} {
    %c0 = arith.constant 0 : index
    %c0_0 = arith.constant 0 : index
    %0 = vector.load %arg3[%c0, %c0_0] : memref<1x32xf32, #tpu.memory_space<vmem>>, vector<1x32xf32>
    %c0_1 = arith.constant 0 : index
    %c0_2 = arith.constant 0 : index
    %1 = vector.load %arg4[%c0_1, %c0_2] : memref<1x32xf32, #tpu.memory_space<vmem>>, vector<1x32xf32>
    %c0_3 = arith.constant 0 : index
    %c0_4 = arith.constant 0 : index
    %2 = vector.load %arg9[%c0_3, %c0_4] : memref<1x32xf32, #tpu.memory_space<vmem>>, vector<1x32xf32>
    %c0_5 = arith.constant 0 : index
    %c0_6 = arith.constant 0 : index
    %3 = vector.load %arg10[%c0_5, %c0_6] : memref<1x32xf32, #tpu.memory_space<vmem>>, vector<1x32xf32>
    %c0_7 = arith.constant 0 : index
    %c0_8 = arith.constant 0 : index
    %4 = vector.load %arg12[%c0_7, %c0_8] : memref<1x128xf32, #tpu.memory_space<vmem>>, vector<1x128xf32>
    %c0_9 = arith.constant 0 : index
    %c0_10 = arith.constant 0 : index
    %5 = vector.load %arg14[%c0_9, %c0_10] : memref<1x32xf32, #tpu.memory_space<vmem>>, vector<1x32xf32>
    %c0_i32 = arith.constant 0 : i32
    %6 = arith.cmpi eq, %arg1, %c0_i32 : i32
    %7 = arith.extui %6 : i1 to i32
    %c0_i32_11 = arith.constant 0 : i32
    %8 = arith.cmpi ne, %7, %c0_i32_11 : i32
    scf.if %8 {
      %c0_58 = arith.constant 0 : index
      %c0_59 = arith.constant 0 : index
      %c0_60 = arith.constant 0 : index
      %119 = vector.load %arg2[%c0_58, %c0_59, %c0_60] : memref<1x8x32xf32, #tpu.memory_space<vmem>>, vector<1x8x32xf32>
      %120 = vector.shape_cast %119 : vector<1x8x32xf32> to vector<8x32xf32>
      %cst_61 = arith.constant dense<0.000000e+00> : vector<8xf32>
      %121 = vector.multi_reduction <add>, %120, %cst_61 [1] : vector<8x32xf32> to vector<8xf32>
      %122 = vector.shape_cast %121 : vector<8xf32> to vector<8x1xf32>
      %cst_62 = arith.constant 3.200000e+01 : f32
      %123 = vector.broadcast %cst_62 : f32 to vector<8x1xf32>
      %124 = arith.divf %122, %123 : vector<8x1xf32>
      %125 = vector.broadcast %124 : vector<8x1xf32> to vector<8x32xf32>
      %126 = arith.subf %120, %125 : vector<8x32xf32>
      %127 = arith.mulf %126, %126 : vector<8x32xf32>
      %cst_63 = arith.constant dense<0.000000e+00> : vector<8xf32>
      %128 = vector.multi_reduction <add>, %127, %cst_63 [1] : vector<8x32xf32> to vector<8xf32>
      %129 = vector.shape_cast %128 : vector<8xf32> to vector<8x1xf32>
      %cst_64 = arith.constant 3.200000e+01 : f32
      %130 = vector.broadcast %cst_64 : f32 to vector<8x1xf32>
      %131 = arith.divf %129, %130 : vector<8x1xf32>
      %132 = vector.broadcast %124 : vector<8x1xf32> to vector<8x32xf32>
      %133 = arith.subf %120, %132 : vector<8x32xf32>
      %cst_65 = arith.constant 9.99999974E-6 : f32
      %134 = vector.broadcast %cst_65 : f32 to vector<8x1xf32>
      %135 = arith.addf %131, %134 : vector<8x1xf32>
      %136 = math.rsqrt %135 : vector<8x1xf32>
      %137 = vector.broadcast %136 : vector<8x1xf32> to vector<8x32xf32>
      %138 = arith.mulf %133, %137 : vector<8x32xf32>
      %139 = vector.broadcast %0 : vector<1x32xf32> to vector<8x32xf32>
      %140 = arith.mulf %138, %139 : vector<8x32xf32>
      %141 = vector.broadcast %1 : vector<1x32xf32> to vector<8x32xf32>
      %142 = arith.addf %140, %141 : vector<8x32xf32>
      %c0_66 = arith.constant 0 : index
      %c0_67 = arith.constant 0 : index
      %143 = vector.load %arg6[%c0_66, %c0_67] : memref<32x32xf32, #tpu.memory_space<vmem>>, vector<32x32xf32>
      %cst_68 = arith.constant dense<0.000000e+00> : vector<8x32xf32>
      %144 = tpu.matmul %142, %143, %cst_68 {dimension_numbers = #tpu.dot_dimension_numbers<[1], [0], [0], [1], [0, 0, 1, 1], [], []>} : vector<8x32xf32>, vector<32x32xf32>, vector<8x32xf32> -> vector<8x32xf32>
      %c0_69 = arith.constant 0 : index
      %c0_70 = arith.constant 0 : index
      %145 = vector.load %arg7[%c0_69, %c0_70] : memref<32x32xf32, #tpu.memory_space<vmem>>, vector<32x32xf32>
      %cst_71 = arith.constant dense<0.000000e+00> : vector<8x32xf32>
      %146 = tpu.matmul %142, %145, %cst_71 {dimension_numbers = #tpu.dot_dimension_numbers<[1], [0], [0], [1], [0, 0, 1, 1], [], []>} : vector<8x32xf32>, vector<32x32xf32>, vector<8x32xf32> -> vector<8x32xf32>
      %147 = vector.extract_strided_slice %144 {offsets = [0, 0], sizes = [8, 8], strides = [1, 1]} : vector<8x32xf32> to vector<8x8xf32>
      %c0_72 = arith.constant 0 : index
      %c0_73 = arith.constant 0 : index
      %c0_74 = arith.constant 0 : index
      %148 = vector.load %arg16[%c0_72, %c0_73, %c0_74] : memref<4x8x8xf32, #tpu.memory_space<vmem>>, vector<1x8x8xf32>
      %149 = vector.shape_cast %148 : vector<1x8x8xf32> to vector<8x8xf32>
      %150 = vector.shape_cast %147 : vector<8x8xf32> to vector<1x8x8xf32>
      tpu.vector_store %arg16[%c0_72, %c0_73, %c0_74], %150 {strides = array<i32>} : memref<4x8x8xf32, #tpu.memory_space<vmem>>, vector<1x8x8xf32>,
      %151 = vector.extract_strided_slice %146 {offsets = [0, 0], sizes = [8, 8], strides = [1, 1]} : vector<8x32xf32> to vector<8x8xf32>
      %c0_75 = arith.constant 0 : index
      %c0_76 = arith.constant 0 : index
      %c0_77 = arith.constant 0 : index
      %152 = vector.load %arg17[%c0_75, %c0_76, %c0_77] : memref<4x8x8xf32, #tpu.memory_space<vmem>>, vector<1x8x8xf32>
      %153 = vector.shape_cast %152 : vector<1x8x8xf32> to vector<8x8xf32>
      %154 = vector.shape_cast %151 : vector<8x8xf32> to vector<1x8x8xf32>
      tpu.vector_store %arg17[%c0_75, %c0_76, %c0_77], %154 {strides = array<i32>} : memref<4x8x8xf32, #tpu.memory_space<vmem>>, vector<1x8x8xf32>,
      %155 = vector.extract_strided_slice %144 {offsets = [0, 8], sizes = [8, 8], strides = [1, 1]} : vector<8x32xf32> to vector<8x8xf32>
      %c1_78 = arith.constant 1 : index
      %c0_79 = arith.constant 0 : index
      %c0_80 = arith.constant 0 : index
      %156 = vector.load %arg16[%c1_78, %c0_79, %c0_80] : memref<4x8x8xf32, #tpu.memory_space<vmem>>, vector<1x8x8xf32>
      %157 = vector.shape_cast %156 : vector<1x8x8xf32> to vector<8x8xf32>
      %158 = vector.shape_cast %155 : vector<8x8xf32> to vector<1x8x8xf32>
      tpu.vector_store %arg16[%c1_78, %c0_79, %c0_80], %158 {strides = array<i32>} : memref<4x8x8xf32, #tpu.memory_space<vmem>>, vector<1x8x8xf32>,
      %159 = vector.extract_strided_slice %146 {offsets = [0, 8], sizes = [8, 8], strides = [1, 1]} : vector<8x32xf32> to vector<8x8xf32>
      %c1_81 = arith.constant 1 : index
      %c0_82 = arith.constant 0 : index
      %c0_83 = arith.constant 0 : index
      %160 = vector.load %arg17[%c1_81, %c0_82, %c0_83] : memref<4x8x8xf32, #tpu.memory_space<vmem>>, vector<1x8x8xf32>
      %161 = vector.shape_cast %160 : vector<1x8x8xf32> to vector<8x8xf32>
      %162 = vector.shape_cast %159 : vector<8x8xf32> to vector<1x8x8xf32>
      tpu.vector_store %arg17[%c1_81, %c0_82, %c0_83], %162 {strides = array<i32>} : memref<4x8x8xf32, #tpu.memory_space<vmem>>, vector<1x8x8xf32>,
      %163 = vector.extract_strided_slice %144 {offsets = [0, 16], sizes = [8, 8], strides = [1, 1]} : vector<8x32xf32> to vector<8x8xf32>
      %c2_84 = arith.constant 2 : index
      %c0_85 = arith.constant 0 : index
      %c0_86 = arith.constant 0 : index
      %164 = vector.load %arg16[%c2_84, %c0_85, %c0_86] : memref<4x8x8xf32, #tpu.memory_space<vmem>>, vector<1x8x8xf32>
      %165 = vector.shape_cast %164 : vector<1x8x8xf32> to vector<8x8xf32>
      %166 = vector.shape_cast %163 : vector<8x8xf32> to vector<1x8x8xf32>
      tpu.vector_store %arg16[%c2_84, %c0_85, %c0_86], %166 {strides = array<i32>} : memref<4x8x8xf32, #tpu.memory_space<vmem>>, vector<1x8x8xf32>,
      %167 = vector.extract_strided_slice %146 {offsets = [0, 16], sizes = [8, 8], strides = [1, 1]} : vector<8x32xf32> to vector<8x8xf32>
      %c2_87 = arith.constant 2 : index
      %c0_88 = arith.constant 0 : index
      %c0_89 = arith.constant 0 : index
      %168 = vector.load %arg17[%c2_87, %c0_88, %c0_89] : memref<4x8x8xf32, #tpu.memory_space<vmem>>, vector<1x8x8xf32>
      %169 = vector.shape_cast %168 : vector<1x8x8xf32> to vector<8x8xf32>
      %170 = vector.shape_cast %167 : vector<8x8xf32> to vector<1x8x8xf32>
      tpu.vector_store %arg17[%c2_87, %c0_88, %c0_89], %170 {strides = array<i32>} : memref<4x8x8xf32, #tpu.memory_space<vmem>>, vector<1x8x8xf32>,
      %171 = vector.extract_strided_slice %144 {offsets = [0, 24], sizes = [8, 8], strides = [1, 1]} : vector<8x32xf32> to vector<8x8xf32>
      %c3_90 = arith.constant 3 : index
      %c0_91 = arith.constant 0 : index
      %c0_92 = arith.constant 0 : index
      %172 = vector.load %arg16[%c3_90, %c0_91, %c0_92] : memref<4x8x8xf32, #tpu.memory_space<vmem>>, vector<1x8x8xf32>
      %173 = vector.shape_cast %172 : vector<1x8x8xf32> to vector<8x8xf32>
      %174 = vector.shape_cast %171 : vector<8x8xf32> to vector<1x8x8xf32>
      tpu.vector_store %arg16[%c3_90, %c0_91, %c0_92], %174 {strides = array<i32>} : memref<4x8x8xf32, #tpu.memory_space<vmem>>, vector<1x8x8xf32>,
      %175 = vector.extract_strided_slice %146 {offsets = [0, 24], sizes = [8, 8], strides = [1, 1]} : vector<8x32xf32> to vector<8x8xf32>
      %c3_93 = arith.constant 3 : index
      %c0_94 = arith.constant 0 : index
      %c0_95 = arith.constant 0 : index
      %176 = vector.load %arg17[%c3_93, %c0_94, %c0_95] : memref<4x8x8xf32, #tpu.memory_space<vmem>>, vector<1x8x8xf32>
      %177 = vector.shape_cast %176 : vector<1x8x8xf32> to vector<8x8xf32>
      %178 = vector.shape_cast %175 : vector<8x8xf32> to vector<1x8x8xf32>
      tpu.vector_store %arg17[%c3_93, %c0_94, %c0_95], %178 {strides = array<i32>} : memref<4x8x8xf32, #tpu.memory_space<vmem>>, vector<1x8x8xf32>,
    } else {
    }
    %c8_i32 = arith.constant 8 : i32
    %9 = arith.muli %arg1, %c8_i32 : i32
    %10 = tpu.assume_multiple %9, 8 : i32
    %c0_12 = arith.constant 0 : index
    %11 = arith.index_cast %10 : i32 to index
    %c0_13 = arith.constant 0 : index
    %12 = vector.load %arg2[%c0_12, %11, %c0_13] : memref<1x8x32xf32, #tpu.memory_space<vmem>>, vector<1x8x32xf32>
    %13 = vector.shape_cast %12 : vector<1x8x32xf32> to vector<8x32xf32>
    %cst = arith.constant dense<0.000000e+00> : vector<8xf32>
    %14 = vector.multi_reduction <add>, %13, %cst [1] : vector<8x32xf32> to vector<8xf32>
    %15 = vector.shape_cast %14 : vector<8xf32> to vector<8x1xf32>
    %cst_14 = arith.constant 3.200000e+01 : f32
    %16 = vector.broadcast %cst_14 : f32 to vector<8x1xf32>
    %17 = arith.divf %15, %16 : vector<8x1xf32>
    %18 = vector.broadcast %17 : vector<8x1xf32> to vector<8x32xf32>
    %19 = arith.subf %13, %18 : vector<8x32xf32>
    %20 = arith.mulf %19, %19 : vector<8x32xf32>
    %cst_15 = arith.constant dense<0.000000e+00> : vector<8xf32>
    %21 = vector.multi_reduction <add>, %20, %cst_15 [1] : vector<8x32xf32> to vector<8xf32>
    %22 = vector.shape_cast %21 : vector<8xf32> to vector<8x1xf32>
    %cst_16 = arith.constant 3.200000e+01 : f32
    %23 = vector.broadcast %cst_16 : f32 to vector<8x1xf32>
    %24 = arith.divf %22, %23 : vector<8x1xf32>
    %25 = vector.broadcast %17 : vector<8x1xf32> to vector<8x32xf32>
    %26 = arith.subf %13, %25 : vector<8x32xf32>
    %cst_17 = arith.constant 9.99999974E-6 : f32
    %27 = vector.broadcast %cst_17 : f32 to vector<8x1xf32>
    %28 = arith.addf %24, %27 : vector<8x1xf32>
    %29 = math.rsqrt %28 : vector<8x1xf32>
    %30 = vector.broadcast %29 : vector<8x1xf32> to vector<8x32xf32>
    %31 = arith.mulf %26, %30 : vector<8x32xf32>
    %32 = vector.broadcast %0 : vector<1x32xf32> to vector<8x32xf32>
    %33 = arith.mulf %31, %32 : vector<8x32xf32>
    %34 = vector.broadcast %1 : vector<1x32xf32> to vector<8x32xf32>
    %35 = arith.addf %33, %34 : vector<8x32xf32>
    %c0_18 = arith.constant 0 : index
    %c0_19 = arith.constant 0 : index
    %36 = vector.load %arg5[%c0_18, %c0_19] : memref<32x32xf32, #tpu.memory_space<vmem>>, vector<32x32xf32>
    %cst_20 = arith.constant dense<0.000000e+00> : vector<8x32xf32>
    %37 = tpu.matmul %35, %36, %cst_20 {dimension_numbers = #tpu.dot_dimension_numbers<[1], [0], [0], [1], [0, 0, 1, 1], [], []>} : vector<8x32xf32>, vector<32x32xf32>, vector<8x32xf32> -> vector<8x32xf32>
    %cst_21 = arith.constant 0.353553385 : f32
    %38 = vector.broadcast %cst_21 : f32 to vector<8x32xf32>
    %39 = arith.mulf %37, %38 : vector<8x32xf32>
    %40 = vector.extract_strided_slice %39 {offsets = [0, 0], sizes = [8, 8], strides = [1, 1]} : vector<8x32xf32> to vector<8x8xf32>
    %c0_22 = arith.constant 0 : index
    %c0_23 = arith.constant 0 : index
    %c0_24 = arith.constant 0 : index
    %41 = vector.load %arg18[%c0_22, %c0_23, %c0_24] : memref<4x8x8xf32, #tpu.memory_space<vmem>>, vector<1x8x8xf32>
    %42 = vector.shape_cast %41 : vector<1x8x8xf32> to vector<8x8xf32>
    %43 = vector.shape_cast %40 : vector<8x8xf32> to vector<1x8x8xf32>
    tpu.vector_store %arg18[%c0_22, %c0_23, %c0_24], %43 {strides = array<i32>} : memref<4x8x8xf32, #tpu.memory_space<vmem>>, vector<1x8x8xf32>,
    %44 = vector.extract_strided_slice %39 {offsets = [0, 8], sizes = [8, 8], strides = [1, 1]} : vector<8x32xf32> to vector<8x8xf32>
    %c1 = arith.constant 1 : index
    %c0_25 = arith.constant 0 : index
    %c0_26 = arith.constant 0 : index
    %45 = vector.load %arg18[%c1, %c0_25, %c0_26] : memref<4x8x8xf32, #tpu.memory_space<vmem>>, vector<1x8x8xf32>
    %46 = vector.shape_cast %45 : vector<1x8x8xf32> to vector<8x8xf32>
    %47 = vector.shape_cast %44 : vector<8x8xf32> to vector<1x8x8xf32>
    tpu.vector_store %arg18[%c1, %c0_25, %c0_26], %47 {strides = array<i32>} : memref<4x8x8xf32, #tpu.memory_space<vmem>>, vector<1x8x8xf32>,
    %48 = vector.extract_strided_slice %39 {offsets = [0, 16], sizes = [8, 8], strides = [1, 1]} : vector<8x32xf32> to vector<8x8xf32>
    %c2 = arith.constant 2 : index
    %c0_27 = arith.constant 0 : index
    %c0_28 = arith.constant 0 : index
    %49 = vector.load %arg18[%c2, %c0_27, %c0_28] : memref<4x8x8xf32, #tpu.memory_space<vmem>>, vector<1x8x8xf32>
    %50 = vector.shape_cast %49 : vector<1x8x8xf32> to vector<8x8xf32>
    %51 = vector.shape_cast %48 : vector<8x8xf32> to vector<1x8x8xf32>
    tpu.vector_store %arg18[%c2, %c0_27, %c0_28], %51 {strides = array<i32>} : memref<4x8x8xf32, #tpu.memory_space<vmem>>, vector<1x8x8xf32>,
    %52 = vector.extract_strided_slice %39 {offsets = [0, 24], sizes = [8, 8], strides = [1, 1]} : vector<8x32xf32> to vector<8x8xf32>
    %c3 = arith.constant 3 : index
    %c0_29 = arith.constant 0 : index
    %c0_30 = arith.constant 0 : index
    %53 = vector.load %arg18[%c3, %c0_29, %c0_30] : memref<4x8x8xf32, #tpu.memory_space<vmem>>, vector<1x8x8xf32>
    %54 = vector.shape_cast %53 : vector<1x8x8xf32> to vector<8x8xf32>
    %55 = vector.shape_cast %52 : vector<8x8xf32> to vector<1x8x8xf32>
    tpu.vector_store %arg18[%c3, %c0_29, %c0_30], %55 {strides = array<i32>} : memref<4x8x8xf32, #tpu.memory_space<vmem>>, vector<1x8x8xf32>,
    %c0_31 = arith.constant 0 : index
    %c0_32 = arith.constant 0 : index
    %c0_33 = arith.constant 0 : index
    %56 = vector.load %arg18[%c0_31, %c0_32, %c0_33] : memref<4x8x8xf32, #tpu.memory_space<vmem>>, vector<4x8x8xf32>
    %57 = tpu.iota {dimensions = array<i32: 0>} : vector<8x8xi32>
    %58 = vector.broadcast %10 : i32 to vector<8x8xi32>
    %59 = arith.addi %58, %57 : vector<8x8xi32>
    %60 = tpu.iota {dimensions = array<i32: 1>} : vector<8x8xi32>
    %cst_34 = arith.constant -1.000000e+30 : f32
    %61 = vector.broadcast %cst_34 : f32 to vector<4x8x1xf32>
    %cst_35 = arith.constant 0.000000e+00 : f32
    %62 = vector.broadcast %cst_35 : f32 to vector<4x8x1xf32>
    %cst_36 = arith.constant 0.000000e+00 : f32
    %63 = vector.broadcast %cst_36 : f32 to vector<4x8x8xf32>
    %c1_i32 = arith.constant 1 : i32
    %64 = arith.addi %arg1, %c1_i32 : i32
    %cst_37 = arith.constant -1.000000e+30 : f32
    %c0_i32_38 = arith.constant 0 : i32
    %65 = arith.subi %64, %c0_i32_38 : i32
    %66 = arith.addi %c0_i32_38, %65 : i32
    %c1_i32_39 = arith.constant 1 : i32
    %67:3 = scf.for %arg19 = %c0_i32_38 to %66 step %c1_i32_39 iter_args(%arg20 = %61, %arg21 = %62, %arg22 = %63) -> (vector<4x8x1xf32>, vector<4x8x1xf32>, vector<4x8x8xf32>)  : i32 {
      %c8_i32_58 = arith.constant 8 : i32
      %119 = arith.muli %arg19, %c8_i32_58 : i32
      %120 = tpu.assume_multiple %119, 8 : i32
      %c0_59 = arith.constant 0 : index
      %121 = arith.index_cast %120 : i32 to index
      %c0_60 = arith.constant 0 : index
      %122 = vector.load %arg16[%c0_59, %121, %c0_60] : memref<4x8x8xf32, #tpu.memory_space<vmem>>, vector<4x8x8xf32>
      %c0_61 = arith.constant 0 : index
      %123 = arith.index_cast %120 : i32 to index
      %c0_62 = arith.constant 0 : index
      %124 = vector.load %arg17[%c0_61, %123, %c0_62] : memref<4x8x8xf32, #tpu.memory_space<vmem>>, vector<4x8x8xf32>
      %cst_63 = arith.constant dense<0.000000e+00> : vector<4x8x8xf32>
      %125 = tpu.matmul %56, %122, %cst_63 {dimension_numbers = #tpu.dot_dimension_numbers<[2], [2], [1], [1], [0, 0, 0, 1, 1, 1], [0], [0]>} : vector<4x8x8xf32>, vector<4x8x8xf32>, vector<4x8x8xf32> -> vector<4x8x8xf32>
      %126 = vector.broadcast %120 : i32 to vector<8x8xi32>
      %127 = arith.addi %126, %60 : vector<8x8xi32>
      %128 = arith.cmpi sle, %127, %59 : vector<8x8xi32>
      %129 = vector.shape_cast %128 : vector<8x8xi1> to vector<1x8x8xi1>
      %130 = vector.shape_cast %129 : vector<1x8x8xi1> to vector<1x8x8xi1>
      %131 = vector.broadcast %130 : vector<1x8x8xi1> to vector<4x8x8xi1>
      %132 = vector.broadcast %cst_37 : f32 to vector<4x8x8xf32>
      %133 = arith.select %131, %125, %132 : vector<4x8x8xi1>, vector<4x8x8xf32>
      %cst_64 = arith.constant dense<0xFF800000> : vector<4x8xf32>
      %134 = vector.multi_reduction <maximumf>, %133, %cst_64 [2] : vector<4x8x8xf32> to vector<4x8xf32>
      %135 = vector.shape_cast %134 : vector<4x8xf32> to vector<4x8x1xf32>
      %136 = arith.maximumf %arg20, %135 : vector<4x8x1xf32>
      %137 = arith.subf %arg20, %136 : vector<4x8x1xf32>
      %138 = math.exp %137 : vector<4x8x1xf32>
      %139 = vector.broadcast %136 : vector<4x8x1xf32> to vector<4x8x8xf32>
      %140 = arith.subf %133, %139 : vector<4x8x8xf32>
      %141 = math.exp %140 : vector<4x8x8xf32>
      %142 = arith.mulf %138, %arg21 : vector<4x8x1xf32>
      %cst_65 = arith.constant dense<0.000000e+00> : vector<4x8xf32>
      %143 = vector.multi_reduction <add>, %141, %cst_65 [2] : vector<4x8x8xf32> to vector<4x8xf32>
      %144 = vector.shape_cast %143 : vector<4x8xf32> to vector<4x8x1xf32>
      %145 = arith.addf %142, %144 : vector<4x8x1xf32>
      %cst_66 = arith.constant dense<0.000000e+00> : vector<4x8x8xf32>
      %146 = tpu.matmul %141, %124, %cst_66 {dimension_numbers = #tpu.dot_dimension_numbers<[2], [1], [1], [2], [0, 0, 0, 1, 1, 2], [0], [0]>} : vector<4x8x8xf32>, vector<4x8x8xf32>, vector<4x8x8xf32> -> vector<4x8x8xf32>
      %147 = vector.broadcast %138 : vector<4x8x1xf32> to vector<4x8x8xf32>
      %148 = arith.mulf %147, %arg22 : vector<4x8x8xf32>
      %149 = arith.addf %148, %146 : vector<4x8x8xf32>
      scf.yield %136, %145, %149 : vector<4x8x1xf32>, vector<4x8x1xf32>, vector<4x8x8xf32>
    }
    %68 = tpu.reciprocal %67#1 {approx = true} : vector<4x8x1xf32> -> vector<4x8x1xf32>
    %69 = vector.broadcast %68 : vector<4x8x1xf32> to vector<4x8x8xf32>
    %70 = arith.mulf %67#2, %69 : vector<4x8x8xf32>
    %71 = vector.extract_strided_slice %70 {offsets = [0, 0, 0], sizes = [1, 8, 8], strides = [1, 1, 1]} : vector<4x8x8xf32> to vector<1x8x8xf32>
    %72 = vector.shape_cast %71 : vector<1x8x8xf32> to vector<8x8xf32>
    %73 = vector.extract_strided_slice %70 {offsets = [1, 0, 0], sizes = [1, 8, 8], strides = [1, 1, 1]} : vector<4x8x8xf32> to vector<1x8x8xf32>
    %74 = vector.shape_cast %73 : vector<1x8x8xf32> to vector<8x8xf32>
    %75 = vector.extract_strided_slice %70 {offsets = [2, 0, 0], sizes = [1, 8, 8], strides = [1, 1, 1]} : vector<4x8x8xf32> to vector<1x8x8xf32>
    %76 = vector.shape_cast %75 : vector<1x8x8xf32> to vector<8x8xf32>
    %77 = vector.extract_strided_slice %70 {offsets = [3, 0, 0], sizes = [1, 8, 8], strides = [1, 1, 1]} : vector<4x8x8xf32> to vector<1x8x8xf32>
    %78 = vector.shape_cast %77 : vector<1x8x8xf32> to vector<8x8xf32>
    %79 = tpu.concatenate %72, %74, %76, %78 in 1 : vector<8x8xf32>, vector<8x8xf32>, vector<8x8xf32>, vector<8x8xf32> -> vector<8x32xf32>
    %c0_40 = arith.constant 0 : index
    %c0_41 = arith.constant 0 : index
    %80 = vector.load %arg8[%c0_40, %c0_41] : memref<32x32xf32, #tpu.memory_space<vmem>>, vector<32x32xf32>
    %cst_42 = arith.constant dense<0.000000e+00> : vector<8x32xf32>
    %81 = tpu.matmul %79, %80, %cst_42 {dimension_numbers = #tpu.dot_dimension_numbers<[1], [0], [0], [1], [0, 0, 1, 1], [], []>} : vector<8x32xf32>, vector<32x32xf32>, vector<8x32xf32> -> vector<8x32xf32>
    %82 = arith.addf %13, %81 : vector<8x32xf32>
    %cst_43 = arith.constant dense<0.000000e+00> : vector<8xf32>
    %83 = vector.multi_reduction <add>, %82, %cst_43 [1] : vector<8x32xf32> to vector<8xf32>
    %84 = vector.shape_cast %83 : vector<8xf32> to vector<8x1xf32>
    %cst_44 = arith.constant 3.200000e+01 : f32
    %85 = vector.broadcast %cst_44 : f32 to vector<8x1xf32>
    %86 = arith.divf %84, %85 : vector<8x1xf32>
    %87 = vector.broadcast %86 : vector<8x1xf32> to vector<8x32xf32>
    %88 = arith.subf %82, %87 : vector<8x32xf32>
    %89 = arith.mulf %88, %88 : vector<8x32xf32>
    %cst_45 = arith.constant dense<0.000000e+00> : vector<8xf32>
    %90 = vector.multi_reduction <add>, %89, %cst_45 [1] : vector<8x32xf32> to vector<8xf32>
    %91 = vector.shape_cast %90 : vector<8xf32> to vector<8x1xf32>
    %cst_46 = arith.constant 3.200000e+01 : f32
    %92 = vector.broadcast %cst_46 : f32 to vector<8x1xf32>
    %93 = arith.divf %91, %92 : vector<8x1xf32>
    %94 = vector.broadcast %86 : vector<8x1xf32> to vector<8x32xf32>
    %95 = arith.subf %82, %94 : vector<8x32xf32>
    %cst_47 = arith.constant 9.99999974E-6 : f32
    %96 = vector.broadcast %cst_47 : f32 to vector<8x1xf32>
    %97 = arith.addf %93, %96 : vector<8x1xf32>
    %98 = math.rsqrt %97 : vector<8x1xf32>
    %99 = vector.broadcast %98 : vector<8x1xf32> to vector<8x32xf32>
    %100 = arith.mulf %95, %99 : vector<8x32xf32>
    %101 = vector.broadcast %2 : vector<1x32xf32> to vector<8x32xf32>
    %102 = arith.mulf %100, %101 : vector<8x32xf32>
    %103 = vector.broadcast %3 : vector<1x32xf32> to vector<8x32xf32>
    %104 = arith.addf %102, %103 : vector<8x32xf32>
    %c0_48 = arith.constant 0 : index
    %c0_49 = arith.constant 0 : index
    %105 = vector.load %arg11[%c0_48, %c0_49] : memref<32x128xf32, #tpu.memory_space<vmem>>, vector<32x128xf32>
    %cst_50 = arith.constant dense<0.000000e+00> : vector<8x128xf32>
    %106 = tpu.matmul %104, %105, %cst_50 {dimension_numbers = #tpu.dot_dimension_numbers<[1], [0], [0], [1], [0, 0, 1, 1], [], []>} : vector<8x32xf32>, vector<32x128xf32>, vector<8x128xf32> -> vector<8x128xf32>
    %107 = vector.broadcast %4 : vector<1x128xf32> to vector<8x128xf32>
    %108 = arith.addf %106, %107 : vector<8x128xf32>
    %cst_51 = arith.constant 0.000000e+00 : f32
    %109 = vector.broadcast %cst_51 : f32 to vector<8x128xf32>
    %110 = arith.maximumf %108, %109 : vector<8x128xf32>
    %c0_52 = arith.constant 0 : index
    %c0_53 = arith.constant 0 : index
    %111 = vector.load %arg13[%c0_52, %c0_53] : memref<128x32xf32, #tpu.memory_space<vmem>>, vector<128x32xf32>
    %cst_54 = arith.constant dense<0.000000e+00> : vector<8x32xf32>
    %112 = tpu.matmul %110, %111, %cst_54 {dimension_numbers = #tpu.dot_dimension_numbers<[1], [0], [0], [1], [0, 0, 1, 1], [], []>} : vector<8x128xf32>, vector<128x32xf32>, vector<8x32xf32> -> vector<8x32xf32>
    %113 = vector.broadcast %5 : vector<1x32xf32> to vector<8x32xf32>
    %114 = arith.addf %112, %113 : vector<8x32xf32>
    %115 = arith.addf %82, %114 : vector<8x32xf32>
    %c0_55 = arith.constant 0 : index
    %c0_56 = arith.constant 0 : index
    %c0_57 = arith.constant 0 : index
    %116 = vector.load %arg15[%c0_55, %c0_56, %c0_57] : memref<1x8x32xf32, #tpu.memory_space<vmem>>, vector<1x8x32xf32>
    %117 = vector.shape_cast %116 : vector<1x8x32xf32> to vector<8x32xf32>
    %118 = vector.shape_cast %115 : vector<8x32xf32> to vector<1x8x32xf32>
    tpu.vector_store %arg15[%c0_55, %c0_56, %c0_57], %118 {strides = array<i32>} : memref<1x8x32xf32, #tpu.memory_space<vmem>>, vector<1x8x32xf32>,
    return
  }
  func.func @transform_0(%arg0: i32, %arg1: i32) -> (i32, i32, i32) {
    %c0_i32 = arith.constant 0 : i32
    %c0_i32_0 = arith.constant 0 : i32
    %c0_i32_1 = arith.constant 0 : i32
    return %arg0, %c0_i32, %c0_i32_0 : i32, i32, i32
  }
  func.func @transform_1(%arg0: i32, %arg1: i32) -> (i32, i32) {
    %c0_i32 = arith.constant 0 : i32
    %c0_i32_0 = arith.constant 0 : i32
    %c0_i32_1 = arith.constant 0 : i32
    return %c0_i32, %c0_i32_0 : i32, i32
  }
  func.func @transform_2(%arg0: i32, %arg1: i32) -> (i32, i32) {
    %c0_i32 = arith.constant 0 : i32
    %c0_i32_0 = arith.constant 0 : i32
    %c0_i32_1 = arith.constant 0 : i32
    return %c0_i32, %c0_i32_0 : i32, i32
  }
  func.func @transform_3(%arg0: i32, %arg1: i32) -> (i32, i32) {
    %c0_i32 = arith.constant 0 : i32
    %c0_i32_0 = arith.constant 0 : i32
    %c0_i32_1 = arith.constant 0 : i32
    return %c0_i32, %c0_i32_0 : i32, i32
  }
  func.func @transform_4(%arg0: i32, %arg1: i32) -> (i32, i32) {
    %c0_i32 = arith.constant 0 : i32
    %c0_i32_0 = arith.constant 0 : i32
    %c0_i32_1 = arith.constant 0 : i32
    return %c0_i32, %c0_i32_0 : i32, i32
  }
  func.func @transform_5(%arg0: i32, %arg1: i32) -> (i32, i32) {
    %c0_i32 = arith.constant 0 : i32
    %c0_i32_0 = arith.constant 0 : i32
    %c0_i32_1 = arith.constant 0 : i32
    return %c0_i32, %c0_i32_0 : i32, i32
  }
  func.func @transform_6(%arg0: i32, %arg1: i32) -> (i32, i32) {
    %c0_i32 = arith.constant 0 : i32
    %c0_i32_0 = arith.constant 0 : i32
    %c0_i32_1 = arith.constant 0 : i32
    return %c0_i32, %c0_i32_0 : i32, i32
  }
  func.func @transform_7(%arg0: i32, %arg1: i32) -> (i32, i32) {
    %c0_i32 = arith.constant 0 : i32
    %c0_i32_0 = arith.constant 0 : i32
    %c0_i32_1 = arith.constant 0 : i32
    return %c0_i32, %c0_i32_0 : i32, i32
  }
  func.func @transform_8(%arg0: i32, %arg1: i32) -> (i32, i32) {
    %c0_i32 = arith.constant 0 : i32
    %c0_i32_0 = arith.constant 0 : i32
    %c0_i32_1 = arith.constant 0 : i32
    return %c0_i32, %c0_i32_0 : i32, i32
  }
  func.func @transform_9(%arg0: i32, %arg1: i32) -> (i32, i32) {
    %c0_i32 = arith.constant 0 : i32
    %c0_i32_0 = arith.constant 0 : i32
    %c0_i32_1 = arith.constant 0 : i32
    return %c0_i32, %c0_i32_0 : i32, i32
  }
  func.func @transform_10(%arg0: i32, %arg1: i32) -> (i32, i32) {
    %c0_i32 = arith.constant 0 : i32
    %c0_i32_0 = arith.constant 0 : i32
    %c0_i32_1 = arith.constant 0 : i32
    return %c0_i32, %c0_i32_0 : i32, i32
  }
  func.func @transform_11(%arg0: i32, %arg1: i32) -> (i32, i32) {
    %c0_i32 = arith.constant 0 : i32
    %c0_i32_0 = arith.constant 0 : i32
    %c0_i32_1 = arith.constant 0 : i32
    return %c0_i32, %c0_i32_0 : i32, i32
  }
  func.func @transform_12(%arg0: i32, %arg1: i32) -> (i32, i32) {
    %c0_i32 = arith.constant 0 : i32
    %c0_i32_0 = arith.constant 0 : i32
    %c0_i32_1 = arith.constant 0 : i32
    return %c0_i32, %c0_i32_0 : i32, i32
  }
  func.func @transform_13(%arg0: i32, %arg1: i32) -> (i32, i32, i32) {
    %c0_i32 = arith.constant 0 : i32
    %c0_i32_0 = arith.constant 0 : i32
    return %arg0, %arg1, %c0_i32 : i32, i32, i32
  }
}

</mosaic_0001>

<bundles_post_ra>
// kernel: tpu_custom_call.1
= control target key start
LH: loop header
LB: loop body
LE: loop exit
PB: predicated region body
PF: predicated region fallthrough
CT: control target
= control target key end

     0   :  { %s2433_s0 = inlined_call_operand.hbm [shape: f32[2,8,32], index: 0, kind: input, shape index: {}]   ;;  %s2434_s1 = inlined_call_operand.hbm [shape: f32[1,32], index: 1, kind: input, shape index: {}]   ;;  %s2435_s2 = inlined_call_operand.vmem [shape: f32[1,32], index: 2, kind: input, shape index: {}]   ;;  %s2436_s3 = inlined_call_operand.vmem [shape: f32[32,32], index: 3, kind: input, shape index: {}]   ;;  %s2437_s4 = inlined_call_operand.vmem [shape: f32[32,32], index: 4, kind: input, shape index: {}]   ;;  %s2438_s5 = inlined_call_operand.vmem [shape: f32[32,32], index: 5, kind: input, shape index: {}]   ;;  %s2439_s6 = inlined_call_operand.vmem [shape: f32[32,32], index: 6, kind: input, shape index: {}]   ;;  %s2440_s7 = inlined_call_operand.vmem [shape: f32[1,32], index: 7, kind: input, shape index: {}]   ;;  %s2441_s8 = inlined_call_operand.vmem [shape: f32[1,32], index: 8, kind: input, shape index: {}]   ;;  %s2442_s9 = inlined_call_operand.vmem [shape: f32[32,128], index: 9, kind: input, shape index: {}]   ;;  %s2443_s10 = inlined_call_operand.vmem [shape: f32[1,128], index: 10, kind: input, shape index: {}]   ;;  %s2444_s11 = inlined_call_operand.vmem [shape: f32[128,32], index: 11, kind: input, shape index: {}]   ;;  %s2445_s12 = inlined_call_operand.vmem [shape: f32[1,32], index: 12, kind: input, shape index: {}]   ;;  %s2446_s13 = inlined_call_operand.hbm [shape: f32[2,8,32], index: 13, kind: output, shape index: {}]  }
   0x1   :  { %2455 = sst [smem:[#allocation18_spill]] %s2433_s0 }
   0x2   :  { %2456 = sst [smem:[#allocation19_spill]] %s2434_s1 }
   0x3   :  { %2457 = sst [smem:[#allocation20_spill]] %s2435_s2 }
   0x4   :  { %2458 = sst [smem:[#allocation21_spill]] %s2439_s6 }
   0x5   :  { %2459 = sst [smem:[#allocation22_spill]] %s2442_s9 }
   0x6   :  { %2460 = sst [smem:[#allocation23_spill]] %s2444_s11 }
   0x7   :  { %2461 = sst [smem:[#allocation24_spill]] %s2446_s13 }
   0x8   :  { %18 = vsyncpa [#allocation6], 0 }
   0x9   :  { %20 = vsyncpa [#allocation6 + $0x1], 0 }
   0xa   :  { %21 = vsyncpa [#allocation9], 0 }
   0xb   :  { %22 = vsyncpa [#allocation7], 0 }
   0xc   :  { %24 = vsyncpa [#allocation7 + $0x1], 0  ;;  %s1911_s25 = smov 0   ;;  %s1913_s26 = smov 0  }
   0xd   :  { %s1915_s27 = smov 0   ;;  %s1917_s28 = smov 0  }
   0xe   :  { %s1919_s29 = smov 0   ;;  %s1921_s30 = smov 0  }
   0xf LB: > { %2462 = sst [smem:[#allocation14_spill]] %s1759_s25  ;;  %s1330_s14 = sadd.s32 4294967295, %s1779_s30   ;;  %s1779_s30 = sphi %s1921_s30, %s30_s30   ;;  %s1775_s29 = sphi %s1919_s29, %s2502_s29   ;;  %s1771_s28 = sphi %s1917_s28, %s2501_s28   ;;  %s1767_s27 = sphi %s1915_s27, %s2500_s27   ;;  %s1763_s26 = sphi %s1913_s26, %s2499_s26   ;;  %s1759_s25 = sphi %s1911_s25, %s2498_s25  }
  0x10   : > { %2463 = sst [smem:[#allocation15_spill]] %s1771_s28  ;;  %s1331_s15 = sadd.s32 4294967294, %s1779_s30  }
  0x11   : > { %p62_p0 = scmp.ne.s32.totalorder %s1763_s26, %s1759_s25  ;;  %p1945_p1 = scmp.eq.s32.totalorder %s1330_s14, 0 }
  0x12   : > { %p1949_p2 = scmp.eq.s32.totalorder %s1330_s14, 1  ;;  %p346_p3 = scmp.eq.s32.totalorder %s1331_s15, 1 }
  0x13   : > { %p1955_p4 = por %p1945_p1, %p62_p0  ;;  %p1332_p5 = scmp.ge.s32.totalorder %s1779_s30, 1 }
  0x14   : > { %p1960_p6 = por %p346_p3, %p62_p0  ;;  %p353_p7 = scmp.lt.s32.totalorder %s1779_s30, 3 }
  0x15   : > { %s2469_s1 = sld [smem:[#allocation19_spill]]  ;;  %p1334_p9 = scmp.ge.s32.totalorder %s1779_s30, 2 }
  0x16   : > { %s2467_s19 = scalar_select %p1960_p6, 1, 0 }
  0x17   : > { %p1968_p8 = pnand %p1332_p5, %p353_p7  ;;  %s1833_s24 = smov [#allocation8]  }
  0x18   : > { %2468 = sst [smem:[#allocation16_spill]] %s2467_s19  ;;  %s367_s14 = sshll.u32 %s1833_s24, 4  ;;  %s368_s14 = int_to_ptr.vmem [resolvable:$true] %s367_s14 }
  0x19   : > { %p1371_p10 = pneg %p1968_p8  ;;  %s42_s15 = sadd.s32 1, %s1775_s29 }
  0x1a   : > { %p44_p12 = scmp.ge.s32.totalorder %s42_s15, 2  ;;  %s49_s20 = sadd.s32 1, %s1767_s27 }
  0x1b   : > { %s365_s22 = sshll.u32 %s2469_s1, 4  ;;  %p1372_p11 = pnand %p1371_p10, %p1945_p1  ;;  %s366_s22 = int_to_ptr.hbm [resolvable:$true] %s365_s22 }
  0x1c   : > { %p56_p13 = scmp.ne.s32.totalorder %s1767_s27, %s1763_s26  ;;  %p57_p0 = scmp.eq.s32.totalorder %s1779_s30, 0 }
  0x1d   : > { %1374 = dma.hbm_to_vmem [thread:$0]  (!%p1372_p11), %s366_s22, 16, %s368_s14, [#allocation9]  }
  0x1e   : > { %s2504_s15 = smov (%p44_p12, %s42_s15), 0  ;;  %p1984_p3 = por %p57_p0, %p56_p13 }
  0x1f   : > { %p1990_p5 = por %p1949_p2, %p56_p13  ;;  %s46_s1 = ssub.s32 %s1775_s29, %s2504_s15 }
  0x20   : > { %p1384_p7 = scmp.lt.s32.totalorder %s1779_s30, 2  ;;  %p47_p10 = scmp.eq.s32.totalorder %s46_s1, 0 }
  0x21   : > { %s2472_s24 = scalar_select %p1990_p5, 1, 0 }
  0x22   : > { %s411_s22 = sand.u32 1, %s1767_s27   ;;  %s1336_s25 = sshll.u32 %s1775_s29, 3 }
  0x23   : > { %2473 = sst [smem:[#allocation17_spill]] %s2472_s24  ;;  %s1335_s14 = sshll.u32 %s411_s22, 3 }
  0x24   : > { %s1999_s19 = scalar_select %p47_p10, %s1767_s27, %s49_s20  }
  0x25   : > { %s2474_s0 = sld [smem:[#allocation18_spill]]  ;;  %s415_s9 = scalar_lea.vmem [#allocation5], %s1335_s14 }
  0x26   : > { %s423_s6 = sshll.u32 %s415_s9, 4  ;;  %p1376_p2 = pnand %p1384_p7, %p1984_p3  ;;  %s424_s6 = int_to_ptr.vmem [resolvable:$true] %s423_s6 }
  0x27   : > { %s412_s24 = scalar_lea.sflag [#allocation6], %s411_s22  ;;  %s2010_s1 = sand.u32 (!%p1968_p8), 1, %s1763_s26  }
  0x28   : > { %s1338_s13 = sshll.u32 (!%p1968_p8), %s2010_s1, 3 }
  0x29   : > { %432 = sbr.rel (%p1968_p8) target bundleno = 1782 (0x6f6), region = 72  ;;  %s438_s9 = scalar_lea.vmem (!%p1968_p8), [#allocation5], %s1338_s13 }
  0x2b   : > { %s419_s11 = scalar_lea.hbm %s2474_s0, %s1336_s25  ;;  %s435_s25 = scalar_lea.sflag (!%p1968_p8), [#allocation6], %s2010_s1 }
  0x2c   : > { %s421_s17 = sshll.u32 %s419_s11, 4  ;;  %s422_s17 = int_to_ptr.hbm [resolvable:$true] %s421_s17 }
  0x2d   : > { %1378 = dma.hbm_to_vmem [thread:$0]  (!%p1376_p2), %s422_s17, 128, %s424_s6, %s412_s24  }
  0x2e   : > { %1746 = dma.done.wait (%p1955_p4), %s435_s25, 128  }
  0x2f   : > { %1748 = vsyncadd (%p1955_p4), %s435_s25, 4294967168 }
  0x30   : > { %1750 = dma.done.wait (%p1945_p1), [#allocation9], 16  }
  0x31   : > { %1752 = vsyncadd (%p1945_p1), [#allocation9], 4294967280  ;;  %vm498_vm0 = vcmask 261120   ;;  %v2027_v0 = vld [vmem:[%s2440_s7] sm:$0x1]  ;;  %v1834_v6 = vmov 32.0  }
  0x32   : > { %v2032_v1 = vld [vmem:[%s2441_s8] sm:$0x1]  ;;  %1549 = vrcp.f32 %v1834_v6  ;;  %v666_v23 = vld [vmem:[%s2436_s3 + $0x18] sm:$0xff]  ;;  %v665_v24 = vld [vmem:[%s2436_s3 + $0x10] sm:$0xff]  ;;  %s2475_s2 = sld [smem:[#allocation20_spill]]  ;;  %vm587_vm8 = vcmask 64512  }
  0x33   : > { %v2037_v2 = vld [vmem:[%s2443_s10] sm:$0x1]  ;;  %682 = vmatpush.msra.mxu2 %v666_v23  ;;  %v664_v25 = vld [vmem:[%s2436_s3 + $0x8] sm:$0xff]  ;;  %v539_v27 = vld [vmem:[%s2437_s4 + $0x18] sm:$0xff]  ;;  %s1835_s21 = smov 104   ;;  %s1836_s24 = smov 120  }
  0x34   : > { %v2042_v3 = vld [vmem:[%s2445_s12] sm:$0x1]  ;;  %v566_v28 = vld [vmem:[%s2438_s5 + $0x18] sm:$0xff]  ;;  %555 = vmatpush.msra.mxu0 %v539_v27  ;;  %v538_v29 = vld [vmem:[%s2437_s4 + $0x10] sm:$0xff]  ;;  %s1837_s16 = smov 112   ;;  %s2131_s22 = scalar_lea.vmem [#allocation10], %s1338_s13 }
  0x35   : > { %v2044_v4 = vld [vmem:[%s438_s9] sm:$0xff]  ;;  %683 = vmatpush.msra.mxu2 %v665_v24  ;;  %579 = vmatpush.msra.mxu1 %v566_v28  ;;  %v565_v30 = vld [vmem:[%s2438_s5 + $0x10] sm:$0xff]  ;;  %v2137_v27 = vmov 0.0   ;;  %v2139_v28 = vmov 0.0   ;;  %s2157_s13 = smov 0  }
  0x36   : > { %v626_v5 = vsel %vm498_vm0, %v2044_v4, 0.0  ;;  %v663_v26 = vld [vmem:[%s2436_s3] sm:$0xff]  ;;  %v537_v31 = vld [vmem:[%s2437_s4 + $0x8] sm:$0xff]  ;;  %556 = vmatpush.msra.mxu0 %v538_v29  ;;  %v1547_v49 = vld [vmem:[#allocation8] ss:$0 sm:$0xff]  ;;  %v2141_v29 = vmov 0.0  }
  0x37   : > { %627 = vadd.xlane.f32.xlu0 %v626_v5  ;;  %684 = vmatpush.msra.mxu2 %v664_v25  ;;  %v564_v32 = vld [vmem:[%s2438_s5 + $0x8] sm:$0xff]  ;;  %v536_v35 = vld [vmem:[%s2437_s4] sm:$0xff]  ;;  %v2133_v25 = vmov 0.0  }
  0x38   : > { %v1550_v7 = vpop.eup %1549  ;;  %580 = vmatpush.msra.mxu1 %v565_v30  ;;  %v563_v36 = vld [vmem:[%s2438_s5] sm:$0xff]  ;;  %557 = vmatpush.msra.mxu0 %v537_v31  ;;  %v2143_v30 = vmov 0.0   ;;  %v2145_v31 = vmov 0.0  }
  0x39   : > { %v503_v8 = vmul.f32 32.0, %v1550_v7  ;;  %vm507_vm1 = vweird.f32 %v1550_v7  ;;  %685 = vmatpush.msra.mxu2 %v663_v26  ;;  %v1548_v52 = vld [vmem:[%s2475_s2] ss:$0 sm:$0xff]  ;;  %v2135_v26 = vmov 0.0  }
  0x3a   : > { %581 = vmatpush.msra.mxu1 %v564_v32  ;;  %558 = vmatpush.msra.mxu0 %v536_v35  ;;  %v2147_v32 = vmov 0.0   ;;  %v2153_v35 = vmov -1e+30  }
  0x3b   : > { %v504_v9 = vsub.f32 1.0, %v503_v8 }
  0x3c   : > { %582 = vmatpush.msra.mxu1 %v563_v36  ;;  %v2155_v36 = vmov -1e+30  }
  0x3d   : > { %v505_v10 = vmul.f32 %v1550_v7, %v504_v9 }
  0x3f   : > { %500 = vadd.xlane.f32.xlu0 %v626_v5  ;;  %v506_v11 = vadd.f32 %v1550_v7, %v505_v10 }
  0x41   : > { %v2048_v12 = vsel %vm507_vm1, %v1550_v7, %v506_v11  ;;  %v713_v11 = vlaneseq }
  0xaa   : > { %v628_v13 = vpop.xlane.xlu0 %627 }
  0xab   : > { %v636_v14 = vmul.f32 %v628_v13, %v2048_v12  ;;  %v2112_v13 = vshrl.u32 %v713_v11, 7 }
  0xad   : > { %v637_v15 = vsub.f32 %v2044_v4, %v636_v14  ;;  %v2114_v14 = vand.u32 127, %v713_v11 }
  0xaf   : > { %v638_v16 = vmul.f32 %v637_v15, %v637_v15 }
  0xb1   : > { %v639_v17 = vsel %vm498_vm0, %v638_v16, 0.0 }
  0xb2   : > { %640 = vadd.xlane.f32.xlu1 %v639_v17  ;;  %v501_v18 = vpop.xlane.xlu0 %500 }
  0xb3   : > { %v509_v19 = vmul.f32 %v2048_v12, %v501_v18 }
  0xb5   : > { %v2055_v20 = vsub.f32 %v2044_v4, %v509_v19 }
  0xb7   : > { %v511_v21 = vmul.f32 %v2055_v20, %v2055_v20 }
  0xb9   : > { %v512_v22 = vsel %vm498_vm0, %v511_v21, 0.0 }
  0xba   : > { %513 = vadd.xlane.f32.xlu1 %v512_v22 }
 0x125   : > { %v641_v33 = vpop.xlane.xlu1 %640 }
 0x126   : > { %v642_v34 = vmul.f32 %v641_v33, %v2048_v12  ;;  %v2149_v33 = vmov -1e+30  }
 0x128   : > { %v643_v37 = vadd.f32 1e-05, %v642_v34  ;;  %v2151_v34 = vmov -1e+30  }
 0x12a   : > { %1551 = vrsqrt.f32 %v643_v37  ;;  %vm650_vm3 = vweird.f32 %v643_v37 }
 0x12d   : > { %v514_v38 = vpop.xlane.xlu1 %513 }
 0x12e   : > { %v515_v39 = vmul.f32 %v514_v38, %v2048_v12 }
 0x130   : > { %v1552_v40 = vpop.eup %1551  ;;  %v516_v41 = vadd.f32 1e-05, %v515_v39 }
 0x131   : > { %v645_v42 = vmul.f32 %v1552_v40, %v643_v37  ;;  %vm651_vm2 = vweird.f32 %v1552_v40 }
 0x132   : > { %1553 = vrsqrt.f32 %v516_v41  ;;  %vm652_vm4 = vmor %vm650_vm3, %vm651_vm2  ;;  %vm523_vm6 = vweird.f32 %v516_v41 }
 0x133   : > { %v646_v43 = vmul.f32 %v1552_v40, %v645_v42 }
 0x135   : > { %v647_v44 = vmul.f32 0.5, %v646_v43 }
 0x137   : > { %v648_v45 = vsub.f32 1.5, %v647_v44 }
 0x138   : > { %v1554_v46 = vpop.eup %1553 }
 0x139   : > { %v649_v47 = vmul.f32 %v1552_v40, %v648_v45  ;;  %v518_v48 = vmul.f32 %v1554_v46, %v516_v41  ;;  %vm524_vm5 = vweird.f32 %v1554_v46 }
 0x13a   : > { %vm525_vm7 = vmor %vm523_vm6, %vm524_vm5 }
 0x13b   : > { %v653_v50 = vsel %vm652_vm4, %v1552_v40, %v649_v47  ;;  %v519_v51 = vmul.f32 %v1554_v46, %v518_v48 }
 0x13c   : > { %v654_v53 = vmul.f32 %v653_v50, %v637_v15 }
 0x13d   : > { %v520_v54 = vmul.f32 0.5, %v519_v51 }
 0x13e   : > { %v658_v55 = vmul.f32 %v1547_v49, %v654_v53 }
 0x13f   : > { %v521_v56 = vsub.f32 1.5, %v520_v54 }
 0x140   : > { %v662_v57 = vadd.f32 %v1548_v52, %v658_v55 }
 0x141   : > { %v522_v58 = vmul.f32 %v1554_v46, %v521_v56 }
 0x142   : > { %1343 = vmatmul.msk.f32.vlgmr.msra.gmra.mxu2 %vm498_vm0, %v662_v57 }
 0x143   : > { %v526_v59 = vsel %vm525_vm7, %v1554_v46, %v522_v58 }
 0x144   : > { %v527_v60 = vmul.f32 %v526_v59, %v2055_v20 }
 0x146   : > { %v531_v61 = vmul.f32 %v1547_v49, %v527_v60 }
 0x148   : > { %v535_v62 = vadd.f32 %v1548_v52, %v531_v61 }
 0x14a   : > { %1341 = vmatmul.msk.f32.vlgmr.msra.gmra.mxu0 %vm498_vm0, %v535_v62  ;;  %1342 = vmatmul.msk.f32.vlgmr.msra.gmra.mxu1 %vm498_vm0, %v535_v62 }
 0x1c5   : > { %v687_v63 = vpop.f32.mrf.mxu2 }
 0x1c6   : > { %v690_v5 = vmul.f32 0.35355338, %v687_v63 }
 0x1c7   : > { %v560_v6 = vpop.f32.mrf.mxu0  ;;  %v584_v7 = vpop.f32.mrf.mxu1 }
 0x1c8   : > { %692 = vst.msk [vmem:[#allocation4] sm:$0xff] %vm587_vm8, %v690_v5  ;;  %704 = vrot.lane.b32.xlu0 %v690_v5, %s1835_s21  ;;  %597 = vrot.lane.b32.xlu2 %v584_v7, %s1836_s24 }
 0x1c9   : > { %588 = vst.msk [vmem:[#allocation2] sm:$0xff] %vm587_vm8, %v560_v6  ;;  %591 = vrot.lane.b32.xlu1 %v560_v6, %s1836_s24 }
 0x1ca   : > { %589 = vst.msk [vmem:[#allocation3] sm:$0xff] %vm587_vm8, %v584_v7 }
 0x1cf   : > { %v2108_v8 = vld [vmem:[#allocation4] sm:$0xff] }
 0x1d0   : > { %612 = vrot.lane.b32.xlu0 %v560_v6, %s1835_s21  ;;  %602 = vrot.lane.b32.xlu2 %v560_v6, %s1837_s16 }
 0x1d8   : > { %607 = vrot.lane.b32.xlu2 %v584_v7, %s1837_s16 }
 0x1e0   : > { %694 = vrot.lane.b32.xlu2 %v690_v5, %s1836_s24 }
 0x1e8   : > { %699 = vrot.lane.b32.xlu2 %v690_v5, %s1837_s16 }
 0x1f0   : > { %617 = vrot.lane.b32.xlu2 %v584_v7, %s1835_s21 }
 0x222   : > { %v598_v9 = vpop.permute.xlu2 %597 }
 0x223   : > { %601 = vst.msk [vmem:[#allocation3 + $0x8] sm:$0xff] %vm587_vm8, %v598_v9 }
 0x22a   : > { %v603_v10 = vpop.permute.xlu2 %602 }
 0x22b   : > { %606 = vst.msk [vmem:[#allocation2 + $0x10] sm:$0xff] %vm587_vm8, %v603_v10 }
 0x232   : > { %v608_v15 = vpop.permute.xlu2 %607 }
 0x233   : > { %611 = vst.msk [vmem:[#allocation3 + $0x10] sm:$0xff] %vm587_vm8, %v608_v15 }
 0x23a   : > { %v705_v16 = vpop.permute.xlu0 %704  ;;  %v695_v17 = vpop.permute.xlu2 %694 }
 0x23b   : > { %708 = vst.msk [vmem:[#allocation4 + $0x18] sm:$0xff] %vm587_vm8, %v705_v16  ;;  %v592_v18 = vpop.permute.xlu1 %591 }
 0x23c   : > { %698 = vst.msk [vmem:[#allocation4 + $0x8] sm:$0xff] %vm587_vm8, %v695_v17 }
 0x23d   : > { %595 = vst.msk [vmem:[#allocation2 + $0x8] sm:$0xff] %vm587_vm8, %v592_v18 }
 0x242   : > { %v2120_v19 = vld [vmem:[#allocation4 + $0x18] sm:$0xff]  ;;  %v613_v20 = vpop.permute.xlu0 %612  ;;  %v700_v21 = vpop.permute.xlu2 %699 }
 0x243   : > { %v2122_v22 = vld [vmem:[#allocation4 + $0x8] sm:$0xff]  ;;  %616 = vst.msk [vmem:[#allocation2 + $0x18] sm:$0xff] %vm587_vm8, %v613_v20 }
 0x244   : > { %703 = vst.msk [vmem:[#allocation4 + $0x10] sm:$0xff] %vm587_vm8, %v700_v21 }
 0x24a   : > { %v618_v23 = vpop.permute.xlu2 %617 }
 0x24b   : > { %v2126_v24 = vld [vmem:[#allocation4 + $0x10] sm:$0xff]  ;;  %621 = vst.msk [vmem:[#allocation3 + $0x18] sm:$0xff] %vm587_vm8, %v618_v23 }
 0x24c LB: >> { %s2199_s14 = sshll.u32 %s1831_s13, 3  ;;  %s723_s13 = sadd.s32 1, %s1831_s13   ;;  %s1831_s13 = sphi %s2157_s13, %s723_s13   ;;  %v1827_v36 = vphi %v2155_v36, %v2489_v36   ;;  %v1823_v35 = vphi %v2153_v35, %v2488_v35   ;;  %v1819_v34 = vphi %v2151_v34, %v2487_v34   ;;  %v1815_v33 = vphi %v2149_v33, %v2486_v33   ;;  %v1811_v32 = vphi %v2147_v32, %v2485_v32   ;;  %v1807_v31 = vphi %v2145_v31, %v2484_v31   ;;  %v1803_v30 = vphi %v2143_v30, %v2483_v30   ;;  %v1799_v29 = vphi %v2141_v29, %v2482_v29   ;;  %v1795_v28 = vphi %v2139_v28, %v2481_v28   ;;  %v1791_v27 = vphi %v2137_v27, %v2480_v27   ;;  %v1787_v26 = vphi %v2135_v26, %v2479_v26   ;;  %v1783_v25 = vphi %v2133_v25, %v2478_v25  }
 0x24d   : >> { %s739_s17 = scalar_lea.vmem [#allocation2], %s2199_s14  ;;  %v853_v41 = vstv %s2199_s14  ;;  %s744_s25 = scalar_lea.vmem [#allocation3], %s2199_s14 }
 0x24e   : >> { %v740_v37 = vld [vmem:[%s739_s17] sm:$0xff]  ;;  %v742_v38 = vld [vmem:[%s739_s17 + $0x10] sm:$0xff]  ;;  %v741_v39 = vld [vmem:[%s739_s17 + $0x8] sm:$0xff]  ;;  %v854_v42 = vadd.s32 %v853_v41, %v2114_v14  ;;  %p2265_p1 = scmp.ge.s32.totalorder %s723_s13, 1 }
 0x24f   : >> { %1345 = vmatpush.xpose.msk.msra.mxu0 %vm587_vm8, %v740_v37  ;;  %1349 = vmatpush.xpose.msk.msra.mxu2 %vm587_vm8, %v742_v38  ;;  %v743_v40 = vld [vmem:[%s739_s17 + $0x18] sm:$0xff]  ;;  %s1838_s6 = smov (%p2265_p1), 8   ;;  %s1839_s11 = smov (%p2265_p1), 24   ;;  %vm1043_vm10 = vcmask (%p2265_p1), 130048   ;;  %vm1045_vm11 = vcmask (%p2265_p1), 195584  }
 0x250   : >> { %1347 = vmatpush.xpose.msk.msra.mxu1 %vm587_vm8, %v741_v39  ;;  %1351 = vmatpush.xpose.msk.msra.mxu3 %vm587_vm8, %v743_v40  ;;  %vm855_vm9 = vcmp.le.s32.totalorder %v854_v42, %v2112_v13  ;;  %s1840_s28 = smov (%p2265_p1), 16   ;;  %s2490_s18 = sld [smem:[#allocation21_spill]] (%p2265_p1) }
 0x251   : > { %s2492_s14 = sld [smem:[#allocation23_spill]] (%p2265_p1)  ;;  %s1191_s23 = sshll.u32 (%p2265_p1), %s2131_s22, 4  ;;  %s1192_s23 = int_to_ptr.vmem [resolvable:$true] %s1191_s23 }
 0x252   : >> { %1346 = vmatmul.msk.f32.vlgmr.msra.gmra.mxu0 %vm587_vm8, %v2108_v8  ;;  %1350 = vmatmul.msk.f32.vlgmr.msra.gmra.mxu2 %vm587_vm8, %v2126_v24  ;;  %v745_v55 = vld [vmem:[%s744_s25] sm:$0xff]  ;;  %v747_v56 = vld [vmem:[%s744_s25 + $0x10] sm:$0xff]  ;;  %v746_v57 = vld [vmem:[%s744_s25 + $0x8] sm:$0xff]  ;;  %s2493_s9 = sld [smem:[#allocation15_spill]] (%p2265_p1)  ;;  %s1178_s21 = scalar_lea.sflag (%p2265_p1), [#allocation7], %s2010_s1 }
 0x253   : >> { %1348 = vmatmul.msk.f32.vlgmr.msra.gmra.mxu1 %vm587_vm8, %v2122_v22  ;;  %1352 = vmatmul.msk.f32.vlgmr.msra.gmra.mxu3 %vm587_vm8, %v2120_v19  ;;  %v748_v58 = vld [vmem:[%s744_s25 + $0x18] sm:$0xff] }
 0x254   : >> { %940 = vmatpush.msrb.mxu0 %v745_v55  ;;  %986 = vmatpush.msrb.mxu2 %v747_v56 }
 0x255   : >> { %963 = vmatpush.msrb.mxu1 %v746_v57  ;;  %1009 = vmatpush.msrb.mxu3 %v748_v58 }
 0x256   : > { %v1049_v8 = vld [vmem:[%s2490_s18 + $0x10] sm:$0xff] (%p2265_p1)  ;;  %v1048_v13 = vld [vmem:[%s2490_s18 + $0x8] sm:$0xff] (%p2265_p1)  ;;  %v1047_v14 = vld [vmem:[%s2490_s18] sm:$0xff] (%p2265_p1) }
 0x258   : > { %s1360_s16 = sshll.u32 (%p2265_p1), %s2493_s9, 3 }
 0x2cf   : >> { %v772_v43 = vpop.f32.mrf.mxu0 }
 0x2d0   : >> { %v858_v44 = vsel %vm855_vm9, %v772_v43, -1e+30  ;;  %v798_v46 = vpop.f32.mrf.mxu1 }
 0x2d1   : >> { %v862_v45 = vsel %vm587_vm8, %v858_v44, -inf  ;;  %v859_v47 = vsel %vm855_vm9, %v798_v46, -1e+30 }
 0x2d2   : >> { %863 = vmax.xlane.f32.xlu1 %v862_v45  ;;  %v865_v51 = vsel %vm587_vm8, %v859_v47, -inf }
 0x2d5   : >> { %v824_v48 = vpop.f32.mrf.mxu2 }
 0x2d6   : >> { %v860_v49 = vsel %vm855_vm9, %v824_v48, -1e+30  ;;  %v850_v52 = vpop.f32.mrf.mxu3 }
 0x2d7   : >> { %v868_v50 = vsel %vm587_vm8, %v860_v49, -inf  ;;  %v861_v53 = vsel %vm855_vm9, %v850_v52, -1e+30 }
 0x2d8   : >> { %869 = vmax.xlane.f32.xlu0 %v868_v50  ;;  %v871_v54 = vsel %vm587_vm8, %v861_v53, -inf }
 0x2da   : >> { %866 = vmax.xlane.f32.xlu1 %v865_v51 }
 0x2e0   : >> { %872 = vmax.xlane.f32.xlu0 %v871_v54 }
 0x345   : >> { %v864_v59 = vpop.xlane.xlu1 %863 }
 0x346   : >> { %v2223_v60 = vmax.f32 %v1827_v36, %v864_v59  }
 0x348   : >> { %v878_v61 = vsub.f32 %v1827_v36, %v2223_v60  ;;  %v890_v62 = vsub.f32 %v858_v44, %v2223_v60 }
 0x34a   : >> { %v894_v63 = vmul.f32 1.442695, %v890_v62  ;;  %v882_v43 = vmul.f32 1.442695, %v878_v61 }
 0x34b   : >> { %v870_v5 = vpop.xlane.xlu0 %869 }
 0x34c   : >> { %v2229_v6 = vmax.f32 %v1819_v34, %v870_v5   ;;  %1555 = vpow2.f32 %v894_v63 }
 0x34d   : >> { %v867_v7 = vpop.xlane.xlu1 %866 }
 0x34e   : >> { %v880_v9 = vsub.f32 %v1819_v34, %v2229_v6  ;;  %v892_v10 = vsub.f32 %v860_v49, %v2229_v6  ;;  %v2235_v11 = vmax.f32 %v1823_v35, %v867_v7  }
 0x350   : >> { %v898_v15 = vmul.f32 1.442695, %v892_v10  ;;  %v879_v16 = vsub.f32 %v1823_v35, %v2235_v11  ;;  %v891_v17 = vsub.f32 %v859_v47, %v2235_v11  ;;  %v886_v44 = vmul.f32 1.442695, %v880_v9 }
 0x352   : >> { %v896_v18 = vmul.f32 1.442695, %v891_v17  ;;  %v1556_v20 = vpop.eup %1555  ;;  %1557 = vpow2.f32 %v898_v15  ;;  %v884_v45 = vmul.f32 1.442695, %v879_v16 }
 0x353   : >> { %v873_v21 = vpop.xlane.xlu0 %872  ;;  %1353 = vmatmul.msk.f32.vlgmr.msrb.gmra.mxu0 %vm587_vm8, %v1556_v20  ;;  %v906_v34 = vsel %vm587_vm8, %v1556_v20, 0.0 }
 0x354   : >> { %v2241_v23 = vmax.f32 %v1815_v33, %v873_v21   ;;  %1559 = vpow2.f32 %v896_v18  ;;  %907 = vadd.xlane.f32.xlu2 %v906_v34  ;;  %v2487_v34 = vmov %v2229_v6 }
 0x356   : >> { %v881_v36 = vsub.f32 %v1815_v33, %v2241_v23  ;;  %v893_v35 = vsub.f32 %v861_v53, %v2241_v23 }
 0x358   : >> { %v900_v37 = vmul.f32 1.442695, %v893_v35  ;;  %v1558_v38 = vpop.eup %1557  ;;  %v888_v48 = vmul.f32 1.442695, %v881_v36  ;;  %v2488_v35 = vmov %v2235_v11  ;;  %v2489_v36 = vmov %v2223_v60  ;;  %v1050_v60 = vld [vmem:[%s2490_s18 + $0x18] sm:$0xff] (%p2265_p1) }
 0x359   : >> { %1355 = vmatmul.msk.f32.vlgmr.msrb.gmra.mxu2 %vm587_vm8, %v1558_v38  ;;  %v912_v39 = vsel %vm587_vm8, %v1558_v38, 0.0  ;;  %1066 = vmatpush.msra.mxu0 (%p2265_p1), %v1050_v60 }
 0x35a   : >> { %v1560_v40 = vpop.eup %1559  ;;  %1561 = vpow2.f32 %v900_v37  ;;  %913 = vadd.xlane.f32.xlu0 %v912_v39 }
 0x35b   : >> { %1354 = vmatmul.msk.f32.vlgmr.msrb.gmra.mxu1 %vm587_vm8, %v1560_v40  ;;  %v909_v41 = vsel %vm587_vm8, %v1560_v40, 0.0  ;;  %1563 = vpow2.f32 %v882_v43  ;;  %1067 = vmatpush.msra.mxu0 (%p2265_p1), %v1049_v8 }
 0x35c   : >> { %910 = vadd.xlane.f32.xlu2 %v909_v41  ;;  %1565 = vpow2.f32 %v886_v44 }
 0x35d   : >> { %1567 = vpow2.f32 %v884_v45  ;;  %1068 = vmatpush.msra.mxu0 (%p2265_p1), %v1048_v13 }
 0x35e   : >> { %1569 = vpow2.f32 %v888_v48  ;;  %v1149_v48 = vld [vmem:[%s2492_s14 + $0x68] sm:$0xff] (%p2265_p1) }
 0x35f   : > { %1069 = vmatpush.msra.mxu0 (%p2265_p1), %v1047_v14 }
 0x360   : >> { %v1562_v42 = vpop.eup %1561 }
 0x361   : >> { %1356 = vmatmul.msk.f32.vlgmr.msrb.gmra.mxu3 %vm587_vm8, %v1562_v42  ;;  %v915_v33 = vsel %vm587_vm8, %v1562_v42, 0.0  ;;  %v1564_v46 = vpop.eup %1563 }
 0x362   : >> { %916 = vadd.xlane.f32.xlu1 %v915_v33  ;;  %v902_v47 = vmul.f32 %v1811_v32, %v1564_v46  ;;  %v1566_v51 = vpop.eup %1565  ;;  %v1014_v58 = vmul.f32 %v1795_v28, %v1564_v46  ;;  %v2486_v33 = vmov %v2241_v23  ;;  %v1151_v46 = vld [vmem:[%s2492_s14 + $0x78] sm:$0xff] (%p2265_p1) }
 0x363   : >> { %v1568_v52 = vpop.eup %1567  ;;  %v904_v53 = vmul.f32 %v1803_v30, %v1566_v51  ;;  %v1016_v30 = vmul.f32 %v1787_v26, %v1566_v51  ;;  %1155 = vmatpush.msra.mxu2 (%p2265_p1), %v1151_v46  ;;  %v1148_v51 = vld [vmem:[%s2492_s14 + $0x60] sm:$0xff] (%p2265_p1) }
 0x364   : >> { %v903_v56 = vmul.f32 %v1807_v31, %v1568_v52  ;;  %v1570_v62 = vpop.eup %1569 }
 0x365   : >> { %v905_v5 = vmul.f32 %v1799_v29, %v1570_v62  ;;  %v1017_v31 = vmul.f32 %v1783_v25, %v1570_v62  ;;  %v1141_v62 = vld [vmem:[%s2492_s14 + $0x28] sm:$0xff] (%p2265_p1) }
 0x3c7   : >> { %v908_v49 = vpop.xlane.xlu2 %907 }
 0x3c8   : >> { %v2255_v32 = vadd.f32 %v908_v49, %v902_v47   ;;  %v1150_v47 = vld [vmem:[%s2492_s14 + $0x70] sm:$0xff] (%p2265_p1) }
 0x3c9   : > { %1156 = vmatpush.msra.mxu2 (%p2265_p1), %v1150_v47 }
 0x3ca   : >> { %v2476_v50 = vmov %v2255_v32  ;;  %v1015_v32 = vmul.f32 %v1791_v27, %v1568_v52 }
 0x3cb   : > { %1157 = vmatpush.msra.mxu2 (%p2265_p1), %v1149_v48 }
 0x3cd   : >> { %v914_v54 = vpop.xlane.xlu0 %913  ;;  %1158 = vmatpush.msra.mxu2 (%p2265_p1), %v1148_v51 }
 0x3ce   : >> { %v920_v55 = vadd.f32 %v914_v54, %v904_v53   ;;  %v1147_v53 = vld [vmem:[%s2492_s14 + $0x58] sm:$0xff] (%p2265_p1)  ;;  %v1146_v54 = vld [vmem:[%s2492_s14 + $0x50] sm:$0xff] (%p2265_p1) }
 0x3cf   : >> { %v911_v57 = vpop.xlane.xlu2 %910  ;;  %1159 = vmatpush.msra.mxu2 (%p2265_p1), %v1147_v53 }
 0x3d0   : >> { %v919_v59 = vadd.f32 %v911_v57, %v903_v56   ;;  %v942_v61 = vpop.f32.mrf.mxu0  ;;  %v1143_v57 = vld [vmem:[%s2492_s14 + $0x38] sm:$0xff] (%p2265_p1) }
 0x3d1   : >> { %v1018_v63 = vadd.f32 %v1014_v58, %v942_v61   ;;  %1160 = vmatpush.msra.mxu2 (%p2265_p1), %v1146_v54 }
 0x3d2   : > { %1571 = vrcp.f32 (%p2265_p1), %v919_v59 }
 0x3d3   : >> { %v2481_v28 = vmov %v1018_v63 }
 0x3d5   : >> { %v917_v7 = vpop.xlane.xlu1 %916 }
 0x3d6   : >> { %v921_v9 = vadd.f32 %v917_v7, %v905_v5   ;;  %v1140_v5 = vld [vmem:[%s2492_s14 + $0x20] sm:$0xff] (%p2265_p1) }
 0x3d8   : >> { %v965_v10 = vpop.f32.mrf.mxu1  ;;  %v2482_v29 = vmov %v921_v9  ;;  %1573 = vrcp.f32 (%p2265_p1), %v921_v9  ;;  %v1572_v21 = vpop.eup (%p2265_p1), %1571  ;;  %v1139_v9 = vld [vmem:[%s2492_s14 + $0x18] sm:$0xff] (%p2265_p1) }
 0x3d9   : >> { %v1019_v15 = vadd.f32 %v1015_v32, %v965_v10   ;;  %v2485_v32 = vmov %v2476_v50  ;;  %1575 = vrcp.f32 (%p2265_p1), %v920_v55  ;;  %v1098_v10 = vperm.slane (%p2265_p1), %v2027_v0, 0  ;;  %v1137_v0 = vld [vmem:[%s2492_s14 + $0x8] sm:$0xff] (%p2265_p1) }
 0x3da   : > { %1577 = vrcp.f32 (%p2265_p1), %v2476_v50 }
 0x3db   : >> { %v2480_v27 = vmov %v1019_v15  ;;  %v1027_v36 = vmul.f32 (%p2265_p1), %v1572_v21, %v1019_v15 }
 0x3dc   : >> { %v988_v16 = vpop.f32.mrf.mxu2 }
 0x3dd   : >> { %v1020_v17 = vadd.f32 %v1016_v30, %v988_v16   ;;  %v2483_v30 = vmov %v920_v55  ;;  %1031 = vrot.lane.b32.xlu0 (%p2265_p1), %v1027_v36, %s1838_s6  ;;  %s2491_s6 = sld [smem:[#allocation22_spill]] (%p2265_p1)  ;;  %v1144_v55 = vld [vmem:[%s2492_s14 + $0x40] sm:$0xff] (%p2265_p1)  ;;  %v1102_v16 = vperm.slane (%p2265_p1), %v2032_v1, 0  ;;  %v1110_v1 = vperm.slane (%p2265_p1), %v2037_v2, 0 }
 0x3de   : > { %v1574_v37 = vpop.eup (%p2265_p1), %1573 }
 0x3df   : >> { %v2479_v26 = vmov %v1020_v17  ;;  %v1576_v6 = vpop.eup (%p2265_p1), %1575 }
 0x3e0   : > { %v1028_v11 = vmul.f32 (%p2265_p1), %v1576_v6, %v1020_v17  ;;  %v1578_v22 = vpop.eup (%p2265_p1), %1577 }
 0x3e1   : > { %v1026_v24 = vmul.f32 (%p2265_p1), %v1578_v22, %v1018_v63 }
 0x3e3   : > { %725 = sbr.rel (!%p2265_p1) target bundleno = 588 (0x24c), region = 144  ;;  %v1108_v43 = vld [vmem:[%s2491_s6 + $0x18] sm:$0xff] (%p2265_p1)  ;;  %v1106_v44 = vld [vmem:[%s2491_s6 + $0x8] sm:$0xff] (%p2265_p1)  ;;  %v1105_v45 = vld [vmem:[%s2491_s6] sm:$0xff] (%p2265_p1) }
 0x3e4   : >> { %v1011_v18 = vpop.f32.mrf.mxu3  ;;  %1127 = vmatpush.msra.mxu1 (%p2265_p1), %v1108_v43 }
 0x3e5   : >> { %v1021_v20 = vadd.f32 %v1017_v31, %v1011_v18   ;;  %v2484_v31 = vmov %v919_v59  ;;  %1035 = vrot.lane.b32.xlu0 (%p2265_p1), %v1028_v11, %s1840_s28  ;;  %v1142_v59 = vld [vmem:[%s2492_s14 + $0x30] sm:$0xff] (%p2265_p1) }
 0x3e6   : > { %v1138_v18 = vld [vmem:[%s2492_s14 + $0x10] sm:$0xff] (%p2265_p1) }
 0x3e7   : >> { %v2478_v25 = vmov %v1021_v20  ;;  %v1029_v23 = vmul.f32 (%p2265_p1), %v1574_v37, %v1021_v20  ;;  %v1136_v20 = vld [vmem:[%s2492_s14] sm:$0xff] (%p2265_p1) }
 0x3e9   : > { %1039 = vrot.lane.b32.xlu1 %v1029_v23, %s1839_s11  ;;  %v1153_v23 = vperm.slane %v2042_v3, 0  ;;  %s2495_s11 = sld [smem:[#allocation24_spill]] }
 0x3ef   : > { %s1189_s28 = scalar_lea.hbm %s2495_s11, %s1360_s16  ;;  %s1661_s25 = scalar_lea.hbm %s2495_s11, 16 }
 0x3f0   : > { %s1193_s20 = sshll.u32 %s1189_s28, 4  ;;  %s1194_s20 = int_to_ptr.hbm [resolvable:$true] %s1193_s20 }
 0x3f1   : > { %s1655_s24 = sshra.s32 %s1194_s20, 4  ;;  %s1656_s24 = int_to_ptr.hbm [resolvable:$true] %s1655_s24 }
 0x3f2   : > { %s1657_s9 = scalar_lea.hbm %s1656_s24, 8  ;;  %p1662_p12 = scmp.lt.s32.totalorder %s1656_s24, %s2495_s11 }
 0x3f3   : > { %p1658_p4 = scmp.ne.s32.totalorder %s1656_s24, %s1657_s9  ;;  %p1663_p13 = scmp.lt.s32.totalorder %s1661_s25, %s1657_s9 }
 0x3f5   : > { %p1659_p8 = pnand %p1658_p4, %p1990_p5  ;;  %p1664_p0 = por %p1663_p13, %p1662_p12 }
 0x3f7   : > { %p1660_p11 = pneg %p1659_p8 }
 0x3f9   : > { %p1665_p3 = pnand %p1664_p0, %p1660_p11 }
 0x44f   : > { %v1032_v19 = vpop.permute.xlu0 %1031 }
 0x450   : > { %v1042_v26 = vsel %vm587_vm8, %v1026_v24, %v1032_v19 }
 0x457   : > { %v1036_v27 = vpop.permute.xlu0 %1035 }
 0x458   : > { %v1044_v28 = vsel %vm1043_vm10, %v1042_v26, %v1036_v27 }
 0x45b   : > { %v1040_v25 = vpop.permute.xlu1 %1039 }
 0x45c   : > { %v1046_v29 = vsel %vm1045_vm11, %v1044_v28, %v1040_v25 }
 0x45d   : > { %1357 = vmatmul.msk.f32.vlgmr.msra.gmra.mxu0 %vm498_vm0, %v1046_v29 }
 0x4da   : > { %v1071_v34 = vpop.f32.mrf.mxu0 }
 0x4db   : > { %v2318_v35 = vadd.f32 %v1071_v34, %v2044_v4  ;;  %v1107_v4 = vld [vmem:[%s2491_s6 + $0x10] sm:$0xff] }
 0x4dc   : > { %1128 = vmatpush.msra.mxu1 %v1107_v4 }
 0x4dd   : > { %v1075_v38 = vsel %vm498_vm0, %v2318_v35, 0.0 }
 0x4de   : > { %1076 = vadd.xlane.f32.xlu1 %v1075_v38  ;;  %1129 = vmatpush.msra.mxu1 %v1106_v44 }
 0x4e0   : > { %1130 = vmatpush.msra.mxu1 %v1105_v45 }
 0x551   : > { %v1077_v39 = vpop.xlane.xlu1 %1076 }
 0x552   : > { %v1078_v40 = vmul.f32 %v1077_v39, %v2048_v12 }
 0x554   : > { %v1079_v41 = vsub.f32 %v2318_v35, %v1078_v40 }
 0x556   : > { %v1080_v42 = vmul.f32 %v1079_v41, %v1079_v41 }
 0x558   : > { %v1081_v33 = vsel %vm498_vm0, %v1080_v42, 0.0 }
 0x559   : > { %1082 = vadd.xlane.f32.xlu2 %v1081_v33 }
 0x5cc   : > { %v1083_v49 = vpop.xlane.xlu2 %1082 }
 0x5cd   : > { %v1084_v50 = vmul.f32 %v1083_v49, %v2048_v12  ;;  %v1145_v12 = vld [vmem:[%s2492_s14 + $0x48] sm:$0xff] }
 0x5ce   : > { %1161 = vmatpush.msra.mxu2 %v1145_v12 }
 0x5cf   : > { %v1085_v52 = vadd.f32 1e-05, %v1084_v50 }
 0x5d0   : > { %1162 = vmatpush.msra.mxu2 %v1144_v55 }
 0x5d1   : > { %1579 = vrsqrt.f32 %v1085_v52  ;;  %vm1092_vm13 = vweird.f32 %v1085_v52 }
 0x5d2   : > { %1163 = vmatpush.msra.mxu2 %v1143_v57 }
 0x5d4   : > { %1164 = vmatpush.msra.mxu2 %v1142_v59 }
 0x5d6   : > { %1165 = vmatpush.msra.mxu2 %v1141_v62 }
 0x5d7   : > { %v1580_v56 = vpop.eup %1579 }
 0x5d8   : > { %v1087_v58 = vmul.f32 %v1580_v56, %v1085_v52  ;;  %vm1093_vm12 = vweird.f32 %v1580_v56  ;;  %1166 = vmatpush.msra.mxu2 %v1140_v5 }
 0x5d9   : > { %vm1094_vm14 = vmor %vm1092_vm13, %vm1093_vm12 }
 0x5da   : > { %v1088_v61 = vmul.f32 %v1580_v56, %v1087_v58  ;;  %1167 = vmatpush.msra.mxu2 %v1139_v9 }
 0x5dc   : > { %v1089_v63 = vmul.f32 0.5, %v1088_v61  ;;  %1168 = vmatpush.msra.mxu2 %v1138_v18 }
 0x5de   : > { %v1090_v7 = vsub.f32 1.5, %v1089_v63  ;;  %1169 = vmatpush.msra.mxu2 %v1137_v0 }
 0x5e0   : > { %v1091_v32 = vmul.f32 %v1580_v56, %v1090_v7  ;;  %1170 = vmatpush.msra.mxu2 %v1136_v20 }
 0x5e2   : > { %v1095_v15 = vsel %vm1094_vm14, %v1580_v56, %v1091_v32 }
 0x5e3   : > { %v1096_v30 = vmul.f32 %v1095_v15, %v1079_v41 }
 0x5e5   : > { %v1100_v17 = vmul.f32 %v1098_v10, %v1096_v30 }
 0x5e7   : > { %v1104_v31 = vadd.f32 %v1102_v16, %v1100_v17 }
 0x5e9   : > { %1358 = vmatmul.msk.f32.vlgmr.msra.gmra.mxu1 %vm498_vm0, %v1104_v31 }
 0x666   : > { %v1132_v21 = vpop.f32.mrf.mxu1 }
 0x667   : > { %v1133_v36 = vadd.f32 %v1132_v21, %v1110_v1 }
 0x669   : > { %v1135_v37 = vmax.f32 %v1133_v36, 0.0 }
 0x66b   : > { %1171 = vmatmul.f32.vlgmr.msra.gmra.mxu2 %v1135_v37 }
 0x6ee   : > { %v1172_v6 = vpop.f32.mrf.mxu2 }
 0x6ef   : > { %v1173_v11 = vadd.f32 %v1172_v6, %v1153_v23 }
 0x6f1   : > { %v1175_v60 = vadd.f32 %v1173_v11, %v2318_v35 }
 0x6f3   : > { %1176 = vst.msk [vmem:[%s2131_s22] sm:$0xff] %vm498_vm0, %v1175_v60 }
 0x6f4   : > { %1668 = shalt.err (!%p1665_p3)
}
 0x6f5   : > { %1369 = dma.vmem_to_hbm [thread:$0]  (%p1990_p5), %s1192_s23, 128, %s1194_s20, %s1178_s21  }
 0x6f6 PF: > { %s2496_s1 = sld [smem:[#allocation14_spill]]  ;;  %p1380_p7 = pnand %p1334_p9, %p1960_p6 }
 0x6f8   : > { %p1381_p10 = pneg %p1380_p7 }
 0x6fc   : > { %s1205_s2 = sand.u32 1, %s2496_s1  }
 0x6fd   : > { %s1206_s17 = scalar_lea.sflag [#allocation7], %s1205_s2 }
 0x6fe   : > { %1754 = dma.done.wait (%p1381_p10), %s1206_s17, 128  }
 0x6ff   : > { %1756 = vsyncadd (%p1381_p10), %s1206_s17, 4294967168  ;;  %s30_s30 = sadd.s32 1, %s1779_s30   ;;  %s2498_s25 = smov %s1763_s26 }
 0x700   : > { %p27_p2 = scmp.ge.s32.totalorder %s30_s30, 4   ;;  %s2499_s26 = smov %s1767_s27 }
 0x701   : > { %s2500_s27 = smov %s1999_s19  ;;  %s2501_s28 = smov %s1775_s29 }
 0x702   : > { %s2502_s29 = smov %s2504_s15  ;;  %29 = sbr.rel (!%p27_p2) target bundleno = 15 (0xf), region = 155 }
 0x707   :  { %1212 = vsyncpa [#allocation6], 1 }
 0x708   :  { %1214 = vsyncpa [#allocation6 + $0x1], 1 }
 0x709   :  { %1215 = vsyncpa [#allocation9], 1 }
 0x70a   :  { %1216 = vsyncpa [#allocation7], 1 }
 0x70b   :  { %1218 = vsyncpa [#allocation7 + $0x1], 1 }

</bundles_post_ra>
